<compile_context>
chip_gen: v5e
topology: v5e:2x2
jax: 0.10.0
libtpu: 0.0.40
codegen_flags: <defaults>
</compile_context>

<pallas_src>
import functools

import jax
import jax.numpy as jnp
from jax import lax
from jax.experimental import pallas as pl
from jax.experimental.pallas import tpu as pltpu


# ---------------------------------------------------------------------------
# Pallas kernel: the whole RepBlock chain for a block of B images.
# ---------------------------------------------------------------------------
def _repblock_kernel(x_ref, *rest, H, B, nblocks):
    """Fused RepBlock forward for B images per grid step.

    x_ref   : (B, H, W*Cin_p)        bf16 input (channel-padded, rows unpadded)
    per block i:
      w_ref : (3, W*Cin_i, W*Cout_p) banded conv matrices (bf16)
      b_ref : (1, W*Cout_p)          bias tiled over W (f32)
    o_ref   : (B, H, W*Cout_p)       bf16, lane-dense output
    pad_in  : (B*(H+2), W*Cin_p)     bf16 scratch: image-interleaved row-padded x
    pad_mid : (B*(H+2), W*Cout_p)    bf16 scratch for intermediate activations
                                     (only present when nblocks > 1)
    """
    w_refs = rest[0:2 * nblocks:2]
    b_refs = rest[1:2 * nblocks:2]
    o_ref = rest[2 * nblocks]
    pad_in = rest[2 * nblocks + 1]
    pad_mid = rest[2 * nblocks + 2] if nblocks > 1 else None

    Hp = H + 2
    M = B * Hp - 2                      # rows fed to the MXU per banded matmul

    def zero_row(ref, r):
        ref[r:r + 1, :] = jnp.zeros((1, ref.shape[1]), ref.dtype)

    # Zero ONLY the border rows of the padded scratch buffers (centre rows are
    # always overwritten).  This is 2 rows per image and is done every grid
    # step so the pattern stays correct under any grid sharding/ordering
    # (e.g. CORE_PARALLEL on v7x), at negligible store cost.
    for b in range(B):
        zero_row(pad_in, b * Hp)
        zero_row(pad_in, b * Hp + H + 1)
    if pad_mid is not None:
        zero_row(pad_mid, 0)
        zero_row(pad_mid, B * Hp - 1)

    # Row padding happens here, inside VMEM: copy this step's images into the
    # centre rows of the interleaved padded buffer (no padded x copy in HBM).
    for b in range(B):
        pad_in[b * Hp + 1:b * Hp + 1 + H, :] = x_ref[b]

    def rep_conv(src_ref, w_ref, b_ref):
        # 3x3 conv == 3 banded matmuls (one per kernel row).  Band windows are
        # read directly as ref slices at sublane offsets 0/1/2; f32 accumulation.
        acc = jnp.dot(src_ref[0:M, :], w_ref[0],
                      preferred_element_type=jnp.float32)
        acc = acc + jnp.dot(src_ref[1:M + 1, :], w_ref[1],
                            preferred_element_type=jnp.float32)
        acc = acc + jnp.dot(src_ref[2:M + 2, :], w_ref[2],
                            preferred_element_type=jnp.float32)
        # Rows b*Hp .. b*Hp+H-1 are image b's H output rows; the 2 rows between
        # images are structural filler (overwritten by zeros on re-pad / never
        # stored to HBM).
        return jnp.maximum(acc + b_ref[...], 0.0)        # (M, W*Cout_p) f32

    # Block 0 reads the padded input buffer.
    act = rep_conv(pad_in, w_refs[0], b_refs[0])

    # Remaining blocks: re-pad the intermediate inside VMEM (bf16 scratch).
    # Shifting the M rows down by one lands every image's rows exactly in its
    # padded slot; the filler rows land on the image-boundary rows, which are
    # then re-zeroed (2*(B-1) single-row stores).
    for i in range(1, nblocks):
        pad_mid[1:M + 1, :] = act.astype(pad_mid.dtype)
        for b in range(1, B):
            zero_row(pad_mid, b * Hp - 1)
            zero_row(pad_mid, b * Hp)
        act = rep_conv(pad_mid, w_refs[i], b_refs[i])

    # Lane-dense bf16 writeback (last dim multiple of 128 -> unmasked stores).
    act_out = act.astype(o_ref.dtype)
    for b in range(B):
        o_ref[b] = act_out[b * Hp:b * Hp + H]


# ---------------------------------------------------------------------------
# Plain-JAX parameter glue (runs once per call, outside the kernel).
# ---------------------------------------------------------------------------
def _fold_to_deploy(p):
    """RepVGG switch_to_deploy: fold 1x1-BN + identity-BN into one 3x3 kernel+bias."""
    k = p["w3"].at[1, 1].add(p["w1"])           # 1x1 branch -> centre tap
    b = p["b3"] + p["b1"]
    if p["sid"] is not None:                    # identity BN (Cin == Cout only)
        cin = k.shape[2]
        k = k.at[1, 1].add(jnp.eye(cin, dtype=k.dtype) * p["sid"])
        b = b + p["bid"]
    return k, b                                 # (3,3,Cin,Cout), (1,Cout)


def _pad_channels(k3, bias, cin_p, cout_p):
    """Zero-pad kernel/bias channels so W*C becomes a multiple of 128."""
    cin, cout = k3.shape[2], k3.shape[3]
    k3 = jnp.pad(k3, ((0, 0), (0, 0), (0, cin_p - cin), (0, cout_p - cout)))
    bias = jnp.pad(bias, ((0, 0), (0, cout_p - cout)))
    return k3, bias


def _build_band_weights(k3, bias, W):
    """Lower a 3x3 kernel (HWIO) to three banded matrices M_dy of shape
    (W*Cin, W*Cout) with M_dy[w*Cin+ci, j*Cout+co] = k3[dy, w-j+1, ci, co] for
    |w-j| <= 1, so that conv3x3(x)[h] = sum_dy rowpad(x)[h+dy] @ M_dy on the
    2-D (row, W*C) layout (column padding is implicit: out-of-range taps are
    simply dropped, which is exact for zero padding)."""
    _, _, Cin, Cout = k3.shape
    dx = jnp.arange(W)[:, None] - jnp.arange(W)[None, :] + 1      # (W, W)
    valid = (dx >= 0) & (dx <= 2)
    dxc = jnp.clip(dx, 0, 2)
    mats = []
    for dy in range(3):
        blocks = jnp.where(valid[:, :, None, None], k3[dy][dxc], 0.0)  # (W,W,Cin,Cout)
        mats.append(blocks.transpose(0, 2, 1, 3).reshape(W * Cin, W * Cout))
    wm = jnp.stack(mats).astype(jnp.bfloat16)                     # (3, W*Cin, W*Cout)
    bt = jnp.tile(bias, (1, W)).astype(jnp.float32)               # (1, W*Cout)
    return wm, bt


def _pad_to_lane(c, W, lane=128):
    cp = c
    while (W * cp) % lane:
        cp += 1
    return cp


# ---------------------------------------------------------------------------
# Wrapper
# ---------------------------------------------------------------------------
def repblock_apply(x, params_list):
    """RepBlock.forward (EVAL mode) on NHWC input, fused into one pallas_call.

    Returns bf16 NHWC output.
    TODO(synk): training-mode BatchNorm (batch statistics) is not implemented;
    eval-mode running-stat BN is folded into the conv weights.
    """
    N, H, W, Cin = x.shape
    Cout = params_list[0]["w3"].shape[-1]
    nb = len(params_list)

    cin_p = _pad_to_lane(Cin, W)
    cout_p = _pad_to_lane(Cout, W)

    # Gate the banded lowering to small channel counts: the band matrices scale
    # as ~W^2/3 x the 3x3 kernel and their matmul FLOPs as ~W/3 x the conv.
    if W * cin_p > 512 or W * cout_p > 512:
        # TODO(synk): per-tap (K=Cin) matmul path with H/Cout tiling for
        # realistic RepVGG sizes (Cin >= 64, H,W >= 56).
        raise NotImplementedError(
            "banded RepVGG lowering is only used when W*C <= 512")

    # Channel padding is interleaved in the flat (W*C) lane layout, so it must
    # be done host-side; it is fused with the reshape + bf16 cast in one pass.
    if cin_p != Cin:
        x = jnp.pad(x, ((0, 0), (0, 0), (0, 0), (0, cin_p - Cin)))
    x2d = x.reshape(N, H, W * cin_p).astype(jnp.bfloat16)

    # Batch blocking: several images per grid step -> matmul M = B*(H+2)-2.
    row_budget = 512                                  # keep M <= ~512 rows
    b_blk = max(1, min(N, row_budget // (H + 2)))
    while N % b_blk:
        b_blk -= 1
    grid = (N // b_blk,)

    # Fold every RepVGGBlock to deploy form and lower to banded matrices.
    operands = [x2d]
    weight_shapes = []
    for i, p in enumerate(params_list):
        k3, b = _fold_to_deploy(p)
        in_p = cin_p if i == 0 else cout_p
        k3, b = _pad_channels(k3, b, in_p, cout_p)
        wm, bt = _build_band_weights(k3, b, W)
        operands += [wm, bt]
        weight_shapes += [wm.shape, bt.shape]

    kernel = functools.partial(_repblock_kernel, H=H, B=b_blk, nblocks=nb)

    x_spec = pl.BlockSpec((b_blk, H, W * cin_p), lambda n: (n, 0, 0))
    out_spec = pl.BlockSpec((b_blk, H, W * cout_p), lambda n: (n, 0, 0))
    out_shape = jax.ShapeDtypeStruct((N, H, W * cout_p), jnp.bfloat16)

    scratch = [pltpu.VMEM((b_blk * (H + 2), W * cin_p), jnp.bfloat16)]
    if nb > 1:
        scratch.append(pltpu.VMEM((b_blk * (H + 2), W * cout_p), jnp.bfloat16))

    def vmem_bytes(single_buffer_weights):
        wbuf = 1 if single_buffer_weights else 2
        total = 2 * b_blk * H * W * cin_p * 2            # x block, 2 buffers
        total += 2 * b_blk * H * W * cout_p * 2          # out block, 2 buffers
        for shp in weight_shapes:
            elt = 2 if len(shp) == 3 else 4
            n = 1
            for s in shp:
                n *= s
            total += wbuf * n * elt
        total += b_blk * (H + 2) * W * (cin_p + cout_p) * 2   # pad scratches
        return total

    def call(single_buffer_weights):
        in_specs = [x_spec]
        for shp in weight_shapes:
            kw = {}
            if single_buffer_weights:
                # Grid-invariant operands: single-buffer to halve their VMEM.
                kw["pipeline_mode"] = pl.Buffered(1)
            in_specs.append(
                pl.BlockSpec(shp, lambda n, r=len(shp): (0,) * r, **kw))
        limit = min(int(2 * vmem_bytes(single_buffer_weights)) + (4 << 20),
                    100 << 20)
        return pl.pallas_call(
            kernel,
            out_shape=out_shape,
            grid=grid,
            in_specs=in_specs,
            out_specs=out_spec,
            scratch_shapes=scratch,
            compiler_params=pltpu.CompilerParams(
                # TODO(synk): pltpu.CORE_PARALLEL on v7x (2 TensorCores/chip).
                dimension_semantics=("parallel",),
                vmem_limit_bytes=limit),
        )(*operands)

    try:
        out = call(True)
    except Exception:
        # pipeline_mode=pl.Buffered(1) unsupported here -> default buffering.
        out = call(False)

    out = out.reshape(N, H, W, cout_p)
    if cout_p != Cout:
        out = out[..., :Cout]
    return out


# ---------------------------------------------------------------------------
# Pure-JAX references
# ---------------------------------------------------------------------------
def _repvgg_block_ref_f32(x, p):
    out = lax.conv_general_dilated(
        x, p["w3"], (1, 1), ((1, 1), (1, 1)),
        dimension_numbers=("NHWC", "HWIO", "NHWC")) + p["b3"]
    out = out + lax.conv_general_dilated(
        x, p["w1"][None, None], (1, 1), ((0, 0), (0, 0)),
        dimension_numbers=("NHWC", "HWIO", "NHWC")) + p["b1"]
    if p["sid"] is not None:
        out = out + x * p["sid"] + p["bid"]
    return jnp.maximum(out, 0.0)


def repblock_ref_f32(x, params_list):
    """Branch-level f32 reference (exact eval-mode PyTorch semantics)."""
    out = x
    for p in params_list:
        out = _repvgg_block_ref_f32(out, p)
    return out


def repblock_ref_bf16(x, params_list):
    """Mirrors the kernel numerics: deploy-folded 3x3 conv, bf16 operands and
    intermediate activations, f32 accumulation, bias+ReLU in f32, bf16 output."""
    out = x
    for p in params_list:
        k3, b = _fold_to_deploy(p)
        out = lax.conv_general_dilated(
            out.astype(jnp.bfloat16), k3.astype(jnp.bfloat16),
            (1, 1), ((1, 1), (1, 1)),
            dimension_numbers=("NHWC", "HWIO", "NHWC"),
            preferred_element_type=jnp.float32)
        out = jnp.maximum(out + b, 0.0)
    return out.astype(jnp.bfloat16)


# ---------------------------------------------------------------------------
# Deterministic synthetic parameters (BN folded to per-channel scale/bias)
# ---------------------------------------------------------------------------
def make_repvgg_params(key, cin, cout, eps=1e-5):
    ks = jax.random.split(key, 11)

    def bn(k, c):
        k0, k1, k2, k3 = jax.random.split(k, 4)
        gamma = jax.random.uniform(k0, (c,), minval=0.5, maxval=1.5)
        beta = jax.random.normal(k1, (c,)) * 0.1
        mean = jax.random.normal(k2, (c,)) * 0.1
        var = jax.random.uniform(k3, (c,), minval=0.5, maxval=1.5)
        return gamma, beta, mean, var

    w3 = jax.random.normal(ks[0], (3, 3, cin, cout)) * 0.1
    g3, be3, m3, v3 = bn(ks[1], cout)
    s3 = g3 / jnp.sqrt(v3 + eps)
    w3f = w3 * s3[None, None, None, :]
    b3f = (be3 - m3 * s3)[None, :]

    w1 = jax.random.normal(ks[2], (cin, cout)) * 0.1
    g1, be1, m1, v1 = bn(ks[3], cout)
    s1 = g1 / jnp.sqrt(v1 + eps)
    w1f = w1 * s1[None, :]
    b1f = (be1 - m1 * s1)[None, :]

    if cin == cout:          # identity BN branch only when Cin == Cout, stride 1
        gid, beid, mid, vid = bn(ks[4], cin)
        sidv = gid / jnp.sqrt(vid + eps)
        sid = sidv[None, :]
        bid = (beid - mid * sidv)[None, :]
    else:
        sid, bid = None, None

    cast = lambda a: None if a is None else a.astype(jnp.float32)
    return dict(w3=cast(w3f), b3=cast(b3f), w1=cast(w1f), b1=cast(b1f),
                sid=cast(sid), bid=cast(bid))


if __name__ == "__main__":
    key = jax.random.PRNGKey(0)
    kx, kp1, kp2 = jax.random.split(key, 3)

    # RepBlock(in_channels=4, out_channels=8, n=2, block=RepVGGBlock)
    N, Cin, Cout, H, W = 2, 4, 8, 16, 16
    n_blocks = 2

    x_nchw = jax.random.normal(kx, (N, Cin, H, W), jnp.float32)   # PyTorch NCHW
    x = jnp.transpose(x_nchw, (0, 2, 3, 1))                       # -> NHWC

    params_list = [make_repvgg_params(kp1, Cin, Cout)]
    for k in jax.random.split(kp2, n_blocks - 1):
        params_list.append(make_repvgg_params(k, Cout, Cout))

    out = jax.block_until_ready(repblock_apply(x, params_list))
    assert out.shape == (N, H, W, Cout)
    out_f32 = out.astype(jnp.float32)

    # Strict check against a reference with identical bf16 operand/output rounding.
    ref_bf16 = repblock_ref_bf16(x, params_list).astype(jnp.float32)
    assert jnp.allclose(out_f32, ref_bf16, rtol=2e-2, atol=2e-2), (
        "Pallas RepBlock output does not match bf16 deploy reference")

    # Loose check against the exact f32 branch-level (PyTorch eval) semantics;
    # slack accounts for bf16 operand quantization + bf16 output.
    ref_f32 = repblock_ref_f32(x, params_list)
    assert jnp.allclose(out_f32, ref_f32, rtol=6e-2, atol=6e-2), (
        "Pallas RepBlock output deviates from f32 branch-level reference")

    print("KERNEL_OK")
</pallas_src>

<mosaic_0001>
module attributes {stable_mosaic.version = 11 : i64} {
  func.func @_repblock_kernel(%arg0: i32, %arg1: memref<2x16x128xbf16, #tpu.memory_space<vmem>>, %arg2: memref<3x128x128xbf16, #tpu.memory_space<vmem>>, %arg3: memref<1x128xf32, #tpu.memory_space<vmem>>, %arg4: memref<3x128x128xbf16, #tpu.memory_space<vmem>>, %arg5: memref<1x128xf32, #tpu.memory_space<vmem>>, %arg6: memref<2x16x128xbf16, #tpu.memory_space<vmem>>, %arg7: memref<36x128xbf16, #tpu.memory_space<vmem>>, %arg8: memref<36x128xbf16, #tpu.memory_space<vmem>>) attributes {dimension_semantics = [#tpu.dimension_semantics<parallel>], iteration_bounds = array<i64: 1>, scalar_prefetch = 0 : i64, scratch_operands = 2 : i64, tpu.core_type = #tpu.core_type<tc>, window_params = [{transform_indices = @transform_0, window_bounds = array<i64: 2, 16, 128>}, {pipeline_mode = #tpu.pipeline_mode<synchronous>, transform_indices = @transform_1, window_bounds = array<i64: 3, 128, 128>}, {pipeline_mode = #tpu.pipeline_mode<synchronous>, transform_indices = @transform_2, window_bounds = array<i64: 1, 128>}, {pipeline_mode = #tpu.pipeline_mode<synchronous>, transform_indices = @transform_3, window_bounds = array<i64: 3, 128, 128>}, {pipeline_mode = #tpu.pipeline_mode<synchronous>, transform_indices = @transform_4, window_bounds = array<i64: 1, 128>}, {transform_indices = @transform_5, window_bounds = array<i64: 2, 16, 128>}]} {
    %cst = arith.constant 0.000000e+00 : bf16
    %0 = vector.broadcast %cst : bf16 to vector<1x128xbf16>
    %c0 = arith.constant 0 : index
    %c0_0 = arith.constant 0 : index
    %1 = vector.load %arg7[%c0, %c0_0] : memref<36x128xbf16, #tpu.memory_space<vmem>>, vector<1x128xbf16>
    tpu.vector_store %arg7[%c0, %c0_0], %0 {strides = array<i32>} : memref<36x128xbf16, #tpu.memory_space<vmem>>, vector<1x128xbf16>,
    %cst_1 = arith.constant 0.000000e+00 : bf16
    %2 = vector.broadcast %cst_1 : bf16 to vector<1x128xbf16>
    %c17 = arith.constant 17 : index
    %c0_2 = arith.constant 0 : index
    %3 = vector.load %arg7[%c17, %c0_2] : memref<36x128xbf16, #tpu.memory_space<vmem>>, vector<1x128xbf16>
    tpu.vector_store %arg7[%c17, %c0_2], %2 {strides = array<i32>} : memref<36x128xbf16, #tpu.memory_space<vmem>>, vector<1x128xbf16>,
    %cst_3 = arith.constant 0.000000e+00 : bf16
    %4 = vector.broadcast %cst_3 : bf16 to vector<1x128xbf16>
    %c18 = arith.constant 18 : index
    %c0_4 = arith.constant 0 : index
    %5 = vector.load %arg7[%c18, %c0_4] : memref<36x128xbf16, #tpu.memory_space<vmem>>, vector<1x128xbf16>
    tpu.vector_store %arg7[%c18, %c0_4], %4 {strides = array<i32>} : memref<36x128xbf16, #tpu.memory_space<vmem>>, vector<1x128xbf16>,
    %cst_5 = arith.constant 0.000000e+00 : bf16
    %6 = vector.broadcast %cst_5 : bf16 to vector<1x128xbf16>
    %c35 = arith.constant 35 : index
    %c0_6 = arith.constant 0 : index
    %7 = vector.load %arg7[%c35, %c0_6] : memref<36x128xbf16, #tpu.memory_space<vmem>>, vector<1x128xbf16>
    tpu.vector_store %arg7[%c35, %c0_6], %6 {strides = array<i32>} : memref<36x128xbf16, #tpu.memory_space<vmem>>, vector<1x128xbf16>,
    %cst_7 = arith.constant 0.000000e+00 : bf16
    %8 = vector.broadcast %cst_7 : bf16 to vector<1x128xbf16>
    %c0_8 = arith.constant 0 : index
    %c0_9 = arith.constant 0 : index
    %9 = vector.load %arg8[%c0_8, %c0_9] : memref<36x128xbf16, #tpu.memory_space<vmem>>, vector<1x128xbf16>
    tpu.vector_store %arg8[%c0_8, %c0_9], %8 {strides = array<i32>} : memref<36x128xbf16, #tpu.memory_space<vmem>>, vector<1x128xbf16>,
    %cst_10 = arith.constant 0.000000e+00 : bf16
    %10 = vector.broadcast %cst_10 : bf16 to vector<1x128xbf16>
    %c35_11 = arith.constant 35 : index
    %c0_12 = arith.constant 0 : index
    %11 = vector.load %arg8[%c35_11, %c0_12] : memref<36x128xbf16, #tpu.memory_space<vmem>>, vector<1x128xbf16>
    tpu.vector_store %arg8[%c35_11, %c0_12], %10 {strides = array<i32>} : memref<36x128xbf16, #tpu.memory_space<vmem>>, vector<1x128xbf16>,
    %c0_13 = arith.constant 0 : index
    %c0_14 = arith.constant 0 : index
    %c0_15 = arith.constant 0 : index
    %12 = vector.load %arg1[%c0_13, %c0_14, %c0_15] : memref<2x16x128xbf16, #tpu.memory_space<vmem>>, vector<1x16x128xbf16>
    %13 = vector.shape_cast %12 : vector<1x16x128xbf16> to vector<16x128xbf16>
    %c1 = arith.constant 1 : index
    %c0_16 = arith.constant 0 : index
    %14 = vector.load %arg7[%c1, %c0_16] : memref<36x128xbf16, #tpu.memory_space<vmem>>, vector<16x128xbf16>
    tpu.vector_store %arg7[%c1, %c0_16], %13 {strides = array<i32>} : memref<36x128xbf16, #tpu.memory_space<vmem>>, vector<16x128xbf16>,
    %c1_17 = arith.constant 1 : index
    %c0_18 = arith.constant 0 : index
    %c0_19 = arith.constant 0 : index
    %15 = vector.load %arg1[%c1_17, %c0_18, %c0_19] : memref<2x16x128xbf16, #tpu.memory_space<vmem>>, vector<1x16x128xbf16>
    %16 = vector.shape_cast %15 : vector<1x16x128xbf16> to vector<16x128xbf16>
    %c19 = arith.constant 19 : index
    %c0_20 = arith.constant 0 : index
    %17 = vector.load %arg7[%c19, %c0_20] : memref<36x128xbf16, #tpu.memory_space<vmem>>, vector<16x128xbf16>
    tpu.vector_store %arg7[%c19, %c0_20], %16 {strides = array<i32>} : memref<36x128xbf16, #tpu.memory_space<vmem>>, vector<16x128xbf16>,
    %c0_21 = arith.constant 0 : index
    %c0_22 = arith.constant 0 : index
    %18 = vector.load %arg7[%c0_21, %c0_22] : memref<36x128xbf16, #tpu.memory_space<vmem>>, vector<34x128xbf16>
    %c0_23 = arith.constant 0 : index
    %c0_24 = arith.constant 0 : index
    %c0_25 = arith.constant 0 : index
    %19 = vector.load %arg2[%c0_23, %c0_24, %c0_25] : memref<3x128x128xbf16, #tpu.memory_space<vmem>>, vector<1x128x128xbf16>
    %20 = vector.shape_cast %19 : vector<1x128x128xbf16> to vector<128x128xbf16>
    %cst_26 = arith.constant dense<0.000000e+00> : vector<34x128xf32>
    %21 = tpu.matmul %18, %20, %cst_26 {dimension_numbers = #tpu.dot_dimension_numbers<[1], [0], [0], [1], [0, 0, 1, 1], [], []>} : vector<34x128xbf16>, vector<128x128xbf16>, vector<34x128xf32> -> vector<34x128xf32>
    %c1_27 = arith.constant 1 : index
    %c0_28 = arith.constant 0 : index
    %22 = vector.load %arg7[%c1_27, %c0_28] : memref<36x128xbf16, #tpu.memory_space<vmem>>, vector<34x128xbf16>
    %c1_29 = arith.constant 1 : index
    %c0_30 = arith.constant 0 : index
    %c0_31 = arith.constant 0 : index
    %23 = vector.load %arg2[%c1_29, %c0_30, %c0_31] : memref<3x128x128xbf16, #tpu.memory_space<vmem>>, vector<1x128x128xbf16>
    %24 = vector.shape_cast %23 : vector<1x128x128xbf16> to vector<128x128xbf16>
    %cst_32 = arith.constant dense<0.000000e+00> : vector<34x128xf32>
    %25 = tpu.matmul %22, %24, %cst_32 {dimension_numbers = #tpu.dot_dimension_numbers<[1], [0], [0], [1], [0, 0, 1, 1], [], []>} : vector<34x128xbf16>, vector<128x128xbf16>, vector<34x128xf32> -> vector<34x128xf32>
    %26 = arith.addf %21, %25 : vector<34x128xf32>
    %c2 = arith.constant 2 : index
    %c0_33 = arith.constant 0 : index
    %27 = vector.load %arg7[%c2, %c0_33] : memref<36x128xbf16, #tpu.memory_space<vmem>>, vector<34x128xbf16>
    %c2_34 = arith.constant 2 : index
    %c0_35 = arith.constant 0 : index
    %c0_36 = arith.constant 0 : index
    %28 = vector.load %arg2[%c2_34, %c0_35, %c0_36] : memref<3x128x128xbf16, #tpu.memory_space<vmem>>, vector<1x128x128xbf16>
    %29 = vector.shape_cast %28 : vector<1x128x128xbf16> to vector<128x128xbf16>
    %cst_37 = arith.constant dense<0.000000e+00> : vector<34x128xf32>
    %30 = tpu.matmul %27, %29, %cst_37 {dimension_numbers = #tpu.dot_dimension_numbers<[1], [0], [0], [1], [0, 0, 1, 1], [], []>} : vector<34x128xbf16>, vector<128x128xbf16>, vector<34x128xf32> -> vector<34x128xf32>
    %31 = arith.addf %26, %30 : vector<34x128xf32>
    %c0_38 = arith.constant 0 : index
    %c0_39 = arith.constant 0 : index
    %32 = vector.load %arg3[%c0_38, %c0_39] : memref<1x128xf32, #tpu.memory_space<vmem>>, vector<1x128xf32>
    %33 = vector.broadcast %32 : vector<1x128xf32> to vector<34x128xf32>
    %34 = arith.addf %31, %33 : vector<34x128xf32>
    %cst_40 = arith.constant 0.000000e+00 : f32
    %35 = vector.broadcast %cst_40 : f32 to vector<34x128xf32>
    %36 = arith.maximumf %34, %35 : vector<34x128xf32>
    %37 = arith.truncf %36 : vector<34x128xf32> to vector<34x128xbf16>
    %c1_41 = arith.constant 1 : index
    %c0_42 = arith.constant 0 : index
    %38 = vector.load %arg8[%c1_41, %c0_42] : memref<36x128xbf16, #tpu.memory_space<vmem>>, vector<34x128xbf16>
    tpu.vector_store %arg8[%c1_41, %c0_42], %37 {strides = array<i32>} : memref<36x128xbf16, #tpu.memory_space<vmem>>, vector<34x128xbf16>,
    %cst_43 = arith.constant 0.000000e+00 : bf16
    %39 = vector.broadcast %cst_43 : bf16 to vector<1x128xbf16>
    %c17_44 = arith.constant 17 : index
    %c0_45 = arith.constant 0 : index
    %40 = vector.load %arg8[%c17_44, %c0_45] : memref<36x128xbf16, #tpu.memory_space<vmem>>, vector<1x128xbf16>
    tpu.vector_store %arg8[%c17_44, %c0_45], %39 {strides = array<i32>} : memref<36x128xbf16, #tpu.memory_space<vmem>>, vector<1x128xbf16>,
    %cst_46 = arith.constant 0.000000e+00 : bf16
    %41 = vector.broadcast %cst_46 : bf16 to vector<1x128xbf16>
    %c18_47 = arith.constant 18 : index
    %c0_48 = arith.constant 0 : index
    %42 = vector.load %arg8[%c18_47, %c0_48] : memref<36x128xbf16, #tpu.memory_space<vmem>>, vector<1x128xbf16>
    tpu.vector_store %arg8[%c18_47, %c0_48], %41 {strides = array<i32>} : memref<36x128xbf16, #tpu.memory_space<vmem>>, vector<1x128xbf16>,
    %c0_49 = arith.constant 0 : index
    %c0_50 = arith.constant 0 : index
    %43 = vector.load %arg8[%c0_49, %c0_50] : memref<36x128xbf16, #tpu.memory_space<vmem>>, vector<34x128xbf16>
    %c0_51 = arith.constant 0 : index
    %c0_52 = arith.constant 0 : index
    %c0_53 = arith.constant 0 : index
    %44 = vector.load %arg4[%c0_51, %c0_52, %c0_53] : memref<3x128x128xbf16, #tpu.memory_space<vmem>>, vector<1x128x128xbf16>
    %45 = vector.shape_cast %44 : vector<1x128x128xbf16> to vector<128x128xbf16>
    %cst_54 = arith.constant dense<0.000000e+00> : vector<34x128xf32>
    %46 = tpu.matmul %43, %45, %cst_54 {dimension_numbers = #tpu.dot_dimension_numbers<[1], [0], [0], [1], [0, 0, 1, 1], [], []>} : vector<34x128xbf16>, vector<128x128xbf16>, vector<34x128xf32> -> vector<34x128xf32>
    %c1_55 = arith.constant 1 : index
    %c0_56 = arith.constant 0 : index
    %47 = vector.load %arg8[%c1_55, %c0_56] : memref<36x128xbf16, #tpu.memory_space<vmem>>, vector<34x128xbf16>
    %c1_57 = arith.constant 1 : index
    %c0_58 = arith.constant 0 : index
    %c0_59 = arith.constant 0 : index
    %48 = vector.load %arg4[%c1_57, %c0_58, %c0_59] : memref<3x128x128xbf16, #tpu.memory_space<vmem>>, vector<1x128x128xbf16>
    %49 = vector.shape_cast %48 : vector<1x128x128xbf16> to vector<128x128xbf16>
    %cst_60 = arith.constant dense<0.000000e+00> : vector<34x128xf32>
    %50 = tpu.matmul %47, %49, %cst_60 {dimension_numbers = #tpu.dot_dimension_numbers<[1], [0], [0], [1], [0, 0, 1, 1], [], []>} : vector<34x128xbf16>, vector<128x128xbf16>, vector<34x128xf32> -> vector<34x128xf32>
    %51 = arith.addf %46, %50 : vector<34x128xf32>
    %c2_61 = arith.constant 2 : index
    %c0_62 = arith.constant 0 : index
    %52 = vector.load %arg8[%c2_61, %c0_62] : memref<36x128xbf16, #tpu.memory_space<vmem>>, vector<34x128xbf16>
    %c2_63 = arith.constant 2 : index
    %c0_64 = arith.constant 0 : index
    %c0_65 = arith.constant 0 : index
    %53 = vector.load %arg4[%c2_63, %c0_64, %c0_65] : memref<3x128x128xbf16, #tpu.memory_space<vmem>>, vector<1x128x128xbf16>
    %54 = vector.shape_cast %53 : vector<1x128x128xbf16> to vector<128x128xbf16>
    %cst_66 = arith.constant dense<0.000000e+00> : vector<34x128xf32>
    %55 = tpu.matmul %52, %54, %cst_66 {dimension_numbers = #tpu.dot_dimension_numbers<[1], [0], [0], [1], [0, 0, 1, 1], [], []>} : vector<34x128xbf16>, vector<128x128xbf16>, vector<34x128xf32> -> vector<34x128xf32>
    %56 = arith.addf %51, %55 : vector<34x128xf32>
    %c0_67 = arith.constant 0 : index
    %c0_68 = arith.constant 0 : index
    %57 = vector.load %arg5[%c0_67, %c0_68] : memref<1x128xf32, #tpu.memory_space<vmem>>, vector<1x128xf32>
    %58 = vector.broadcast %57 : vector<1x128xf32> to vector<34x128xf32>
    %59 = arith.addf %56, %58 : vector<34x128xf32>
    %cst_69 = arith.constant 0.000000e+00 : f32
    %60 = vector.broadcast %cst_69 : f32 to vector<34x128xf32>
    %61 = arith.maximumf %59, %60 : vector<34x128xf32>
    %62 = arith.truncf %61 : vector<34x128xf32> to vector<34x128xbf16>
    %63 = vector.extract_strided_slice %62 {offsets = [0, 0], sizes = [16, 128], strides = [1, 1]} : vector<34x128xbf16> to vector<16x128xbf16>
    %c0_70 = arith.constant 0 : index
    %c0_71 = arith.constant 0 : index
    %c0_72 = arith.constant 0 : index
    %64 = vector.load %arg6[%c0_70, %c0_71, %c0_72] : memref<2x16x128xbf16, #tpu.memory_space<vmem>>, vector<1x16x128xbf16>
    %65 = vector.shape_cast %64 : vector<1x16x128xbf16> to vector<16x128xbf16>
    %66 = vector.shape_cast %63 : vector<16x128xbf16> to vector<1x16x128xbf16>
    tpu.vector_store %arg6[%c0_70, %c0_71, %c0_72], %66 {strides = array<i32>} : memref<2x16x128xbf16, #tpu.memory_space<vmem>>, vector<1x16x128xbf16>,
    %67 = vector.extract_strided_slice %62 {offsets = [18, 0], sizes = [16, 128], strides = [1, 1]} : vector<34x128xbf16> to vector<16x128xbf16>
    %c1_73 = arith.constant 1 : index
    %c0_74 = arith.constant 0 : index
    %c0_75 = arith.constant 0 : index
    %68 = vector.load %arg6[%c1_73, %c0_74, %c0_75] : memref<2x16x128xbf16, #tpu.memory_space<vmem>>, vector<1x16x128xbf16>
    %69 = vector.shape_cast %68 : vector<1x16x128xbf16> to vector<16x128xbf16>
    %70 = vector.shape_cast %67 : vector<16x128xbf16> to vector<1x16x128xbf16>
    tpu.vector_store %arg6[%c1_73, %c0_74, %c0_75], %70 {strides = array<i32>} : memref<2x16x128xbf16, #tpu.memory_space<vmem>>, vector<1x16x128xbf16>,
    return
  }
  func.func @transform_0(%arg0: i32) -> (i32, i32, i32) {
    %c0_i32 = arith.constant 0 : i32
    %c0_i32_0 = arith.constant 0 : i32
    %c0_i32_1 = arith.constant 0 : i32
    return %arg0, %c0_i32, %c0_i32_0 : i32, i32, i32
  }
  func.func @transform_1(%arg0: i32) -> (i32, i32, i32) {
    %c0_i32 = arith.constant 0 : i32
    %c0_i32_0 = arith.constant 0 : i32
    %c0_i32_1 = arith.constant 0 : i32
    %c0_i32_2 = arith.constant 0 : i32
    return %c0_i32, %c0_i32_0, %c0_i32_1 : i32, i32, i32
  }
  func.func @transform_2(%arg0: i32) -> (i32, i32) {
    %c0_i32 = arith.constant 0 : i32
    %c0_i32_0 = arith.constant 0 : i32
    %c0_i32_1 = arith.constant 0 : i32
    return %c0_i32, %c0_i32_0 : i32, i32
  }
  func.func @transform_3(%arg0: i32) -> (i32, i32, i32) {
    %c0_i32 = arith.constant 0 : i32
    %c0_i32_0 = arith.constant 0 : i32
    %c0_i32_1 = arith.constant 0 : i32
    %c0_i32_2 = arith.constant 0 : i32
    return %c0_i32, %c0_i32_0, %c0_i32_1 : i32, i32, i32
  }
  func.func @transform_4(%arg0: i32) -> (i32, i32) {
    %c0_i32 = arith.constant 0 : i32
    %c0_i32_0 = arith.constant 0 : i32
    %c0_i32_1 = arith.constant 0 : i32
    return %c0_i32, %c0_i32_0 : i32, i32
  }
  func.func @transform_5(%arg0: i32) -> (i32, i32, i32) {
    %c0_i32 = arith.constant 0 : i32
    %c0_i32_0 = arith.constant 0 : i32
    %c0_i32_1 = arith.constant 0 : i32
    return %arg0, %c0_i32, %c0_i32_0 : i32, i32, i32
  }
}

module attributes {stable_mosaic.version = 11 : i64} {
  func.func @_repblock_kernel(%arg0: i32, %arg1: memref<2x16x128xbf16, #tpu.memory_space<vmem>>, %arg2: memref<3x128x128xbf16, #tpu.memory_space<vmem>>, %arg3: memref<1x128xf32, #tpu.memory_space<vmem>>, %arg4: memref<3x128x128xbf16, #tpu.memory_space<vmem>>, %arg5: memref<1x128xf32, #tpu.memory_space<vmem>>, %arg6: memref<2x16x128xbf16, #tpu.memory_space<vmem>>, %arg7: memref<36x128xbf16, #tpu.memory_space<vmem>>, %arg8: memref<36x128xbf16, #tpu.memory_space<vmem>>) attributes {dimension_semantics = [#tpu.dimension_semantics<parallel>], iteration_bounds = array<i64: 1>, scalar_prefetch = 0 : i64, scratch_operands = 2 : i64, tpu.core_type = #tpu.core_type<tc>, window_params = [{transform_indices = @transform_0, window_bounds = array<i64: 2, 16, 128>}, {pipeline_mode = #tpu.pipeline_mode<synchronous>, transform_indices = @transform_1, window_bounds = array<i64: 3, 128, 128>}, {pipeline_mode = #tpu.pipeline_mode<synchronous>, transform_indices = @transform_2, window_bounds = array<i64: 1, 128>}, {pipeline_mode = #tpu.pipeline_mode<synchronous>, transform_indices = @transform_3, window_bounds = array<i64: 3, 128, 128>}, {pipeline_mode = #tpu.pipeline_mode<synchronous>, transform_indices = @transform_4, window_bounds = array<i64: 1, 128>}, {transform_indices = @transform_5, window_bounds = array<i64: 2, 16, 128>}]} {
    %cst = arith.constant 0.000000e+00 : bf16
    %0 = vector.broadcast %cst : bf16 to vector<1x128xbf16>
    %c0 = arith.constant 0 : index
    %c0_0 = arith.constant 0 : index
    %1 = vector.load %arg7[%c0, %c0_0] : memref<36x128xbf16, #tpu.memory_space<vmem>>, vector<1x128xbf16>
    tpu.vector_store %arg7[%c0, %c0_0], %0 {strides = array<i32>} : memref<36x128xbf16, #tpu.memory_space<vmem>>, vector<1x128xbf16>,
    %cst_1 = arith.constant 0.000000e+00 : bf16
    %2 = vector.broadcast %cst_1 : bf16 to vector<1x128xbf16>
    %c17 = arith.constant 17 : index
    %c0_2 = arith.constant 0 : index
    %3 = vector.load %arg7[%c17, %c0_2] : memref<36x128xbf16, #tpu.memory_space<vmem>>, vector<1x128xbf16>
    tpu.vector_store %arg7[%c17, %c0_2], %2 {strides = array<i32>} : memref<36x128xbf16, #tpu.memory_space<vmem>>, vector<1x128xbf16>,
    %cst_3 = arith.constant 0.000000e+00 : bf16
    %4 = vector.broadcast %cst_3 : bf16 to vector<1x128xbf16>
    %c18 = arith.constant 18 : index
    %c0_4 = arith.constant 0 : index
    %5 = vector.load %arg7[%c18, %c0_4] : memref<36x128xbf16, #tpu.memory_space<vmem>>, vector<1x128xbf16>
    tpu.vector_store %arg7[%c18, %c0_4], %4 {strides = array<i32>} : memref<36x128xbf16, #tpu.memory_space<vmem>>, vector<1x128xbf16>,
    %cst_5 = arith.constant 0.000000e+00 : bf16
    %6 = vector.broadcast %cst_5 : bf16 to vector<1x128xbf16>
    %c35 = arith.constant 35 : index
    %c0_6 = arith.constant 0 : index
    %7 = vector.load %arg7[%c35, %c0_6] : memref<36x128xbf16, #tpu.memory_space<vmem>>, vector<1x128xbf16>
    tpu.vector_store %arg7[%c35, %c0_6], %6 {strides = array<i32>} : memref<36x128xbf16, #tpu.memory_space<vmem>>, vector<1x128xbf16>,
    %cst_7 = arith.constant 0.000000e+00 : bf16
    %8 = vector.broadcast %cst_7 : bf16 to vector<1x128xbf16>
    %c0_8 = arith.constant 0 : index
    %c0_9 = arith.constant 0 : index
    %9 = vector.load %arg8[%c0_8, %c0_9] : memref<36x128xbf16, #tpu.memory_space<vmem>>, vector<1x128xbf16>
    tpu.vector_store %arg8[%c0_8, %c0_9], %8 {strides = array<i32>} : memref<36x128xbf16, #tpu.memory_space<vmem>>, vector<1x128xbf16>,
    %cst_10 = arith.constant 0.000000e+00 : bf16
    %10 = vector.broadcast %cst_10 : bf16 to vector<1x128xbf16>
    %c35_11 = arith.constant 35 : index
    %c0_12 = arith.constant 0 : index
    %11 = vector.load %arg8[%c35_11, %c0_12] : memref<36x128xbf16, #tpu.memory_space<vmem>>, vector<1x128xbf16>
    tpu.vector_store %arg8[%c35_11, %c0_12], %10 {strides = array<i32>} : memref<36x128xbf16, #tpu.memory_space<vmem>>, vector<1x128xbf16>,
    %c0_13 = arith.constant 0 : index
    %c0_14 = arith.constant 0 : index
    %c0_15 = arith.constant 0 : index
    %12 = vector.load %arg1[%c0_13, %c0_14, %c0_15] : memref<2x16x128xbf16, #tpu.memory_space<vmem>>, vector<1x16x128xbf16>
    %13 = vector.shape_cast %12 : vector<1x16x128xbf16> to vector<16x128xbf16>
    %c1 = arith.constant 1 : index
    %c0_16 = arith.constant 0 : index
    %14 = vector.load %arg7[%c1, %c0_16] : memref<36x128xbf16, #tpu.memory_space<vmem>>, vector<16x128xbf16>
    tpu.vector_store %arg7[%c1, %c0_16], %13 {strides = array<i32>} : memref<36x128xbf16, #tpu.memory_space<vmem>>, vector<16x128xbf16>,
    %c1_17 = arith.constant 1 : index
    %c0_18 = arith.constant 0 : index
    %c0_19 = arith.constant 0 : index
    %15 = vector.load %arg1[%c1_17, %c0_18, %c0_19] : memref<2x16x128xbf16, #tpu.memory_space<vmem>>, vector<1x16x128xbf16>
    %16 = vector.shape_cast %15 : vector<1x16x128xbf16> to vector<16x128xbf16>
    %c19 = arith.constant 19 : index
    %c0_20 = arith.constant 0 : index
    %17 = vector.load %arg7[%c19, %c0_20] : memref<36x128xbf16, #tpu.memory_space<vmem>>, vector<16x128xbf16>
    tpu.vector_store %arg7[%c19, %c0_20], %16 {strides = array<i32>} : memref<36x128xbf16, #tpu.memory_space<vmem>>, vector<16x128xbf16>,
    %c0_21 = arith.constant 0 : index
    %c0_22 = arith.constant 0 : index
    %18 = vector.load %arg7[%c0_21, %c0_22] : memref<36x128xbf16, #tpu.memory_space<vmem>>, vector<34x128xbf16>
    %c0_23 = arith.constant 0 : index
    %c0_24 = arith.constant 0 : index
    %c0_25 = arith.constant 0 : index
    %19 = vector.load %arg2[%c0_23, %c0_24, %c0_25] : memref<3x128x128xbf16, #tpu.memory_space<vmem>>, vector<1x128x128xbf16>
    %20 = vector.shape_cast %19 : vector<1x128x128xbf16> to vector<128x128xbf16>
    %cst_26 = arith.constant dense<0.000000e+00> : vector<34x128xf32>
    %21 = tpu.matmul %18, %20, %cst_26 {dimension_numbers = #tpu.dot_dimension_numbers<[1], [0], [0], [1], [0, 0, 1, 1], [], []>} : vector<34x128xbf16>, vector<128x128xbf16>, vector<34x128xf32> -> vector<34x128xf32>
    %c1_27 = arith.constant 1 : index
    %c0_28 = arith.constant 0 : index
    %22 = vector.load %arg7[%c1_27, %c0_28] : memref<36x128xbf16, #tpu.memory_space<vmem>>, vector<34x128xbf16>
    %c1_29 = arith.constant 1 : index
    %c0_30 = arith.constant 0 : index
    %c0_31 = arith.constant 0 : index
    %23 = vector.load %arg2[%c1_29, %c0_30, %c0_31] : memref<3x128x128xbf16, #tpu.memory_space<vmem>>, vector<1x128x128xbf16>
    %24 = vector.shape_cast %23 : vector<1x128x128xbf16> to vector<128x128xbf16>
    %cst_32 = arith.constant dense<0.000000e+00> : vector<34x128xf32>
    %25 = tpu.matmul %22, %24, %cst_32 {dimension_numbers = #tpu.dot_dimension_numbers<[1], [0], [0], [1], [0, 0, 1, 1], [], []>} : vector<34x128xbf16>, vector<128x128xbf16>, vector<34x128xf32> -> vector<34x128xf32>
    %26 = arith.addf %21, %25 : vector<34x128xf32>
    %c2 = arith.constant 2 : index
    %c0_33 = arith.constant 0 : index
    %27 = vector.load %arg7[%c2, %c0_33] : memref<36x128xbf16, #tpu.memory_space<vmem>>, vector<34x128xbf16>
    %c2_34 = arith.constant 2 : index
    %c0_35 = arith.constant 0 : index
    %c0_36 = arith.constant 0 : index
    %28 = vector.load %arg2[%c2_34, %c0_35, %c0_36] : memref<3x128x128xbf16, #tpu.memory_space<vmem>>, vector<1x128x128xbf16>
    %29 = vector.shape_cast %28 : vector<1x128x128xbf16> to vector<128x128xbf16>
    %cst_37 = arith.constant dense<0.000000e+00> : vector<34x128xf32>
    %30 = tpu.matmul %27, %29, %cst_37 {dimension_numbers = #tpu.dot_dimension_numbers<[1], [0], [0], [1], [0, 0, 1, 1], [], []>} : vector<34x128xbf16>, vector<128x128xbf16>, vector<34x128xf32> -> vector<34x128xf32>
    %31 = arith.addf %26, %30 : vector<34x128xf32>
    %c0_38 = arith.constant 0 : index
    %c0_39 = arith.constant 0 : index
    %32 = vector.load %arg3[%c0_38, %c0_39] : memref<1x128xf32, #tpu.memory_space<vmem>>, vector<1x128xf32>
    %33 = vector.broadcast %32 : vector<1x128xf32> to vector<34x128xf32>
    %34 = arith.addf %31, %33 : vector<34x128xf32>
    %cst_40 = arith.constant 0.000000e+00 : f32
    %35 = vector.broadcast %cst_40 : f32 to vector<34x128xf32>
    %36 = arith.maximumf %34, %35 : vector<34x128xf32>
    %37 = arith.truncf %36 : vector<34x128xf32> to vector<34x128xbf16>
    %c1_41 = arith.constant 1 : index
    %c0_42 = arith.constant 0 : index
    %38 = vector.load %arg8[%c1_41, %c0_42] : memref<36x128xbf16, #tpu.memory_space<vmem>>, vector<34x128xbf16>
    tpu.vector_store %arg8[%c1_41, %c0_42], %37 {strides = array<i32>} : memref<36x128xbf16, #tpu.memory_space<vmem>>, vector<34x128xbf16>,
    %cst_43 = arith.constant 0.000000e+00 : bf16
    %39 = vector.broadcast %cst_43 : bf16 to vector<1x128xbf16>
    %c17_44 = arith.constant 17 : index
    %c0_45 = arith.constant 0 : index
    %40 = vector.load %arg8[%c17_44, %c0_45] : memref<36x128xbf16, #tpu.memory_space<vmem>>, vector<1x128xbf16>
    tpu.vector_store %arg8[%c17_44, %c0_45], %39 {strides = array<i32>} : memref<36x128xbf16, #tpu.memory_space<vmem>>, vector<1x128xbf16>,
    %cst_46 = arith.constant 0.000000e+00 : bf16
    %41 = vector.broadcast %cst_46 : bf16 to vector<1x128xbf16>
    %c18_47 = arith.constant 18 : index
    %c0_48 = arith.constant 0 : index
    %42 = vector.load %arg8[%c18_47, %c0_48] : memref<36x128xbf16, #tpu.memory_space<vmem>>, vector<1x128xbf16>
    tpu.vector_store %arg8[%c18_47, %c0_48], %41 {strides = array<i32>} : memref<36x128xbf16, #tpu.memory_space<vmem>>, vector<1x128xbf16>,
    %c0_49 = arith.constant 0 : index
    %c0_50 = arith.constant 0 : index
    %43 = vector.load %arg8[%c0_49, %c0_50] : memref<36x128xbf16, #tpu.memory_space<vmem>>, vector<34x128xbf16>
    %c0_51 = arith.constant 0 : index
    %c0_52 = arith.constant 0 : index
    %c0_53 = arith.constant 0 : index
    %44 = vector.load %arg4[%c0_51, %c0_52, %c0_53] : memref<3x128x128xbf16, #tpu.memory_space<vmem>>, vector<1x128x128xbf16>
    %45 = vector.shape_cast %44 : vector<1x128x128xbf16> to vector<128x128xbf16>
    %cst_54 = arith.constant dense<0.000000e+00> : vector<34x128xf32>
    %46 = tpu.matmul %43, %45, %cst_54 {dimension_numbers = #tpu.dot_dimension_numbers<[1], [0], [0], [1], [0, 0, 1, 1], [], []>} : vector<34x128xbf16>, vector<128x128xbf16>, vector<34x128xf32> -> vector<34x128xf32>
    %c1_55 = arith.constant 1 : index
    %c0_56 = arith.constant 0 : index
    %47 = vector.load %arg8[%c1_55, %c0_56] : memref<36x128xbf16, #tpu.memory_space<vmem>>, vector<34x128xbf16>
    %c1_57 = arith.constant 1 : index
    %c0_58 = arith.constant 0 : index
    %c0_59 = arith.constant 0 : index
    %48 = vector.load %arg4[%c1_57, %c0_58, %c0_59] : memref<3x128x128xbf16, #tpu.memory_space<vmem>>, vector<1x128x128xbf16>
    %49 = vector.shape_cast %48 : vector<1x128x128xbf16> to vector<128x128xbf16>
    %cst_60 = arith.constant dense<0.000000e+00> : vector<34x128xf32>
    %50 = tpu.matmul %47, %49, %cst_60 {dimension_numbers = #tpu.dot_dimension_numbers<[1], [0], [0], [1], [0, 0, 1, 1], [], []>} : vector<34x128xbf16>, vector<128x128xbf16>, vector<34x128xf32> -> vector<34x128xf32>
    %51 = arith.addf %46, %50 : vector<34x128xf32>
    %c2_61 = arith.constant 2 : index
    %c0_62 = arith.constant 0 : index
    %52 = vector.load %arg8[%c2_61, %c0_62] : memref<36x128xbf16, #tpu.memory_space<vmem>>, vector<34x128xbf16>
    %c2_63 = arith.constant 2 : index
    %c0_64 = arith.constant 0 : index
    %c0_65 = arith.constant 0 : index
    %53 = vector.load %arg4[%c2_63, %c0_64, %c0_65] : memref<3x128x128xbf16, #tpu.memory_space<vmem>>, vector<1x128x128xbf16>
    %54 = vector.shape_cast %53 : vector<1x128x128xbf16> to vector<128x128xbf16>
    %cst_66 = arith.constant dense<0.000000e+00> : vector<34x128xf32>
    %55 = tpu.matmul %52, %54, %cst_66 {dimension_numbers = #tpu.dot_dimension_numbers<[1], [0], [0], [1], [0, 0, 1, 1], [], []>} : vector<34x128xbf16>, vector<128x128xbf16>, vector<34x128xf32> -> vector<34x128xf32>
    %56 = arith.addf %51, %55 : vector<34x128xf32>
    %c0_67 = arith.constant 0 : index
    %c0_68 = arith.constant 0 : index
    %57 = vector.load %arg5[%c0_67, %c0_68] : memref<1x128xf32, #tpu.memory_space<vmem>>, vector<1x128xf32>
    %58 = vector.broadcast %57 : vector<1x128xf32> to vector<34x128xf32>
    %59 = arith.addf %56, %58 : vector<34x128xf32>
    %cst_69 = arith.constant 0.000000e+00 : f32
    %60 = vector.broadcast %cst_69 : f32 to vector<34x128xf32>
    %61 = arith.maximumf %59, %60 : vector<34x128xf32>
    %62 = arith.truncf %61 : vector<34x128xf32> to vector<34x128xbf16>
    %63 = vector.extract_strided_slice %62 {offsets = [0, 0], sizes = [16, 128], strides = [1, 1]} : vector<34x128xbf16> to vector<16x128xbf16>
    %c0_70 = arith.constant 0 : index
    %c0_71 = arith.constant 0 : index
    %c0_72 = arith.constant 0 : index
    %64 = vector.load %arg6[%c0_70, %c0_71, %c0_72] : memref<2x16x128xbf16, #tpu.memory_space<vmem>>, vector<1x16x128xbf16>
    %65 = vector.shape_cast %64 : vector<1x16x128xbf16> to vector<16x128xbf16>
    %66 = vector.shape_cast %63 : vector<16x128xbf16> to vector<1x16x128xbf16>
    tpu.vector_store %arg6[%c0_70, %c0_71, %c0_72], %66 {strides = array<i32>} : memref<2x16x128xbf16, #tpu.memory_space<vmem>>, vector<1x16x128xbf16>,
    %67 = vector.extract_strided_slice %62 {offsets = [18, 0], sizes = [16, 128], strides = [1, 1]} : vector<34x128xbf16> to vector<16x128xbf16>
    %c1_73 = arith.constant 1 : index
    %c0_74 = arith.constant 0 : index
    %c0_75 = arith.constant 0 : index
    %68 = vector.load %arg6[%c1_73, %c0_74, %c0_75] : memref<2x16x128xbf16, #tpu.memory_space<vmem>>, vector<1x16x128xbf16>
    %69 = vector.shape_cast %68 : vector<1x16x128xbf16> to vector<16x128xbf16>
    %70 = vector.shape_cast %67 : vector<16x128xbf16> to vector<1x16x128xbf16>
    tpu.vector_store %arg6[%c1_73, %c0_74, %c0_75], %70 {strides = array<i32>} : memref<2x16x128xbf16, #tpu.memory_space<vmem>>, vector<1x16x128xbf16>,
    return
  }
  func.func @transform_0(%arg0: i32) -> (i32, i32, i32) {
    %c0_i32 = arith.constant 0 : i32
    %c0_i32_0 = arith.constant 0 : i32
    %c0_i32_1 = arith.constant 0 : i32
    return %arg0, %c0_i32, %c0_i32_0 : i32, i32, i32
  }
  func.func @transform_1(%arg0: i32) -> (i32, i32, i32) {
    %c0_i32 = arith.constant 0 : i32
    %c0_i32_0 = arith.constant 0 : i32
    %c0_i32_1 = arith.constant 0 : i32
    %c0_i32_2 = arith.constant 0 : i32
    return %c0_i32, %c0_i32_0, %c0_i32_1 : i32, i32, i32
  }
  func.func @transform_2(%arg0: i32) -> (i32, i32) {
    %c0_i32 = arith.constant 0 : i32
    %c0_i32_0 = arith.constant 0 : i32
    %c0_i32_1 = arith.constant 0 : i32
    return %c0_i32, %c0_i32_0 : i32, i32
  }
  func.func @transform_3(%arg0: i32) -> (i32, i32, i32) {
    %c0_i32 = arith.constant 0 : i32
    %c0_i32_0 = arith.constant 0 : i32
    %c0_i32_1 = arith.constant 0 : i32
    %c0_i32_2 = arith.constant 0 : i32
    return %c0_i32, %c0_i32_0, %c0_i32_1 : i32, i32, i32
  }
  func.func @transform_4(%arg0: i32) -> (i32, i32) {
    %c0_i32 = arith.constant 0 : i32
    %c0_i32_0 = arith.constant 0 : i32
    %c0_i32_1 = arith.constant 0 : i32
    return %c0_i32, %c0_i32_0 : i32, i32
  }
  func.func @transform_5(%arg0: i32) -> (i32, i32, i32) {
    %c0_i32 = arith.constant 0 : i32
    %c0_i32_0 = arith.constant 0 : i32
    %c0_i32_1 = arith.constant 0 : i32
    return %arg0, %c0_i32, %c0_i32_0 : i32, i32, i32
  }
}

</mosaic_0001>

<bundles_post_ra>
// kernel: tpu_custom_call.1
= control target key start
LH: loop header
LB: loop body
LE: loop exit
PB: predicated region body
PF: predicated region fallthrough
CT: control target
= control target key end

     0   :  { %10 = vsyncpa [#allocation5], 0  ;;  %s1556_s0 = inlined_call_operand.hbm [shape: bf16[2,16,128], index: 0, kind: input, shape index: {}]   ;;  %s1557_s1 = inlined_call_operand.hbm [shape: bf16[3,128,128], index: 1, kind: input, shape index: {}]   ;;  %s1558_s2 = inlined_call_operand.vmem [shape: f32[1,128], index: 2, kind: input, shape index: {}]   ;;  %s1559_s3 = inlined_call_operand.hbm [shape: bf16[3,128,128], index: 3, kind: input, shape index: {}]   ;;  %s1560_s4 = inlined_call_operand.vmem [shape: f32[1,128], index: 4, kind: input, shape index: {}]   ;;  %s1561_s5 = inlined_call_operand.hbm [shape: bf16[2,16,128], index: 5, kind: output, shape index: {}]  }
   0x1   :  { %11 = vsyncpa [#allocation8], 0 }
   0x2   :  { %12 = vsyncpa [#allocation6], 0  ;;  %s30_s20 = sshll.u32 %s1557_s1, 4  ;;  %s1369_s21 = smov [#allocation7]   ;;  %s31_s20 = int_to_ptr.hbm [resolvable:$true] %s30_s20 }
   0x3   :  { %s32_s22 = sshll.u32 %s1369_s21, 4  ;;  %s17_s25 = sshll.u32 %s1556_s0, 4  ;;  %s33_s22 = int_to_ptr.vmem [resolvable:$true] %s32_s22  ;;  %s18_s25 = int_to_ptr.hbm [resolvable:$true] %s17_s25 }
   0x4   :  { %s1370_s26 = smov 64   ;;  %s1371_s27 = smov 4  }
   0x5   :  { %38 = dma.hbm_to_vmem [thread:$0]  %s31_s20, 3072, %s33_s22, [#allocation8], %s1370_s26, %s1370_s26, %s1371_s27  }
   0x6   :  { %s1372_s28 = smov [#allocation4]   ;;  %s45_s1 = sshll.u32 %s1559_s3, 4  ;;  %s46_s1 = int_to_ptr.hbm [resolvable:$true] %s45_s1 }
   0x7   :  { %s19_s29 = sshll.u32 %s1372_s28, 4  ;;  %s1373_s0 = smov [#allocation9]   ;;  %s20_s29 = int_to_ptr.vmem [resolvable:$true] %s19_s29 }
   0x8   :  { %25 = dma.hbm_to_vmem [thread:$0]  %s18_s25, 256, %s20_s29, [#allocation5], %s1370_s26, %s1370_s26, %s1371_s27  }
   0x9   :  { %s47_s7 = sshll.u32 %s1373_s0, 4  ;;  %s48_s7 = int_to_ptr.vmem [resolvable:$true] %s47_s7 }
   0xa   :  { %53 = dma.hbm_to_vmem [thread:$0]  %s46_s1, 3072, %s48_s7, [#allocation8], %s1370_s26, %s1370_s26, %s1371_s27  }
   0xb   :  { %1363 = dma.done.wait [#allocation5], 256  }
   0xc   :  { %1364 = vsyncadd [#allocation5], 4294967040 }
   0xd   :  { %1365 = dma.done.wait [#allocation8], 6144  }
   0xe   :  { %1366 = vsyncadd [#allocation8], 4294961152  ;;  %v1190_v0 = vld [vmem:[#allocation7 + $0x78] sm:$0xff]  ;;  %vm80_vm0 = vcmask 1041409   ;;  %vm86_vm1 = vsmask.f32 7942 }
   0xf   :  { %v1182_v1 = vld [vmem:[#allocation7 + $0x38] sm:$0xff]  ;;  %1243 = vmatpush.bf16.msra.mxu2 %v1190_v0  ;;  %v1189_v2 = vld [vmem:[#allocation7 + $0x70] sm:$0xff]  ;;  %295 = vmatpush.bf16.msra.mxu0 %v1190_v0  ;;  %vm1425_vm2 = vmand %vm80_vm0, %vm86_vm1  ;;  %vm69_vm3 = vcmask 1040384   ;;  %vm70_vm4 = vsmask.f32 256  ;;  %vm163_vm9 = vcmask 1041408  }
  0x10   :  { %1251 = vmatpush.bf16.msra.mxu3 %v1182_v1  ;;  %v1181_v3 = vld [vmem:[#allocation7 + $0x30] sm:$0xff]  ;;  %372 = vmatpush.bf16.msra.mxu1 %v1182_v1  ;;  %vm81_vm5 = vsmask.f32 1280  ;;  %v88_v5 = vld [vmem:[#allocation2 + $0x10] sm:$0x2]  ;;  %v1188_v6 = vld [vmem:[#allocation7 + $0x68] sm:$0xff] }
  0x11   :  { %vm75_vm6 = vsmask.f32 7938  ;;  %vm1431_vm7 = vmand %vm80_vm0, %vm81_vm5  ;;  %v89_v8 = vsel %vm1425_vm2, 0, %v88_v5  ;;  %v132_v9 = vld [vmem:[#allocation4 + $0xc] sm:$0xf]  ;;  %v1180_v10 = vld [vmem:[#allocation7 + $0x28] sm:$0xff] }
  0x12   :  { %90 = vst [vmem:[#allocation2 + $0x10] sm:$0x2] %v89_v8  ;;  %v145_v11 = vshrl.u32 %v132_v9, 16  ;;  %v148_v12 = vshll.u32 %v132_v9, 16  ;;  %vm1439_vm8 = vmand %vm69_vm3, %vm70_vm4  ;;  %v72_v14 = vld [vmem:[#allocation2] sm:$0x1] }
  0x13   :  { %1244 = vmatpush.bf16.msra.mxu2 %v1189_v2  ;;  %296 = vmatpush.bf16.msra.mxu0 %v1189_v2  ;;  %vm1445_vm10 = vmand %vm69_vm3, %vm75_vm6  ;;  %vm99_vm11 = vsmask.f32 4368  ;;  %v1187_v16 = vld [vmem:[#allocation7 + $0x60] sm:$0xff]  ;;  %v73_v19 = vsel %vm1439_vm8, 0, %v72_v14  ;;  %v77_v20 = vld [vmem:[#allocation2 + $0x8] sm:$0x1] }
  0x14   :  { %1252 = vmatpush.bf16.msra.mxu3 %v1181_v3  ;;  %373 = vmatpush.bf16.msra.mxu1 %v1181_v3  ;;  %v147_v17 = vrot.slane %v145_v11, 6  ;;  %v150_v18 = vrot.slane %v148_v12, 7  ;;  %v1179_v21 = vld [vmem:[#allocation7 + $0x20] sm:$0xff]  ;;  %74 = vst [vmem:[#allocation2] sm:$0x1] %v73_v19  ;;  %v78_v22 = vsel %vm1445_vm10, 0, %v77_v20  ;;  %vm1459_vm13 = vmand %vm163_vm9, %vm81_vm5 }
  0x15   :  { %v83_v23 = vld [vmem:[#allocation2 + $0x8] sm:$0x2]  ;;  %79 = vst [vmem:[#allocation2 + $0x8] sm:$0x1] %v78_v22  ;;  %vm121_vm12 = vcmask 1043456   ;;  %v1186_v35 = vld [vmem:[#allocation7 + $0x58] sm:$0xff]  ;;  %vm1474_vm0 = vmor %vm70_vm4, %vm99_vm11 }
  0x16   :  { %v1453_v24 = vor.u32 %v150_v18, %v147_v17  ;;  %v84_v25 = vsel %vm1431_vm7, 0, %v83_v23  ;;  %v97_v26 = vld [vmem:[#allocation4] sm:$0xf]  ;;  %v98_v28 = vld [vmem:[#allocation4 + $0x4] sm:$0xf]  ;;  %v1178_v39 = vld [vmem:[#allocation7 + $0x18] sm:$0xff] }
  0x17   :  { %1245 = vmatpush.bf16.msra.mxu2 %v1188_v6  ;;  %297 = vmatpush.bf16.msra.mxu0 %v1188_v6  ;;  %85 = vst [vmem:[#allocation2 + $0x8] sm:$0x2] %v84_v25  ;;  %v102_v29 = vshrl.u32 %v97_v26, 16  ;;  %v105_v30 = vshll.u32 %v97_v26, 16  ;;  %v110_v32 = vshrl.u32 %v98_v28, 16  ;;  %v113_v33 = vshll.u32 %v98_v28, 16  ;;  %vm1468_vm15 = vmand %vm121_vm12, %vm75_vm6 }
  0x18   :  { %1253 = vmatpush.bf16.msra.mxu3 %v1180_v10  ;;  %374 = vmatpush.bf16.msra.mxu1 %v1180_v10  ;;  %v153_v31 = vrot.slane %v1453_v24, 4  ;;  %v131_v34 = vld [vmem:[#allocation4 + $0x8] sm:$0xf]  ;;  %vm157_vm14 = vcmask 1043457   ;;  %vm133_vm3 = vsmask.f32 5392 }
  0x19   :  { %v165_v36 = vld [vmem:[#allocation2 + $0x10] sm:$0x3]  ;;  %v104_v37 = vrot.slane %v102_v29, 7  ;;  %v136_v38 = vshrl.u32 %v131_v34, 16  ;;  %v112_v41 = vrot.slane %v110_v32, 7  ;;  %v139_v43 = vshll.u32 %v131_v34, 16  ;;  %vm1480_vm6 = vmand %vm157_vm14, %vm86_vm1 }
  0x1a   :  { %v166_v40 = vsel %vm1459_vm13, %v153_v31, %v165_v36  ;;  %v1185_v52 = vld [vmem:[#allocation7 + $0x50] sm:$0xff]  ;;  %vm134_vm1 = vmor %vm81_vm5, %vm133_vm3  ;;  %v1184_v63 = vld [vmem:[#allocation7 + $0x48] sm:$0xff]  ;;  %vm220_vm4 = vsmask.f32 7424  ;;  %vm416_vm5 = vcmask 1046528   ;;  %s959_s13 = sshll.u32 %s1561_s5, 4  ;;  %s960_s13 = int_to_ptr.hbm [resolvable:$true] %s959_s13 }
  0x1b   :  { %1246 = vmatpush.bf16.msra.mxu2 %v1187_v16  ;;  %298 = vmatpush.bf16.msra.mxu0 %v1187_v16  ;;  %167 = vst [vmem:[#allocation2 + $0x10] sm:$0x3] %v166_v40  ;;  %v107_v45 = vor.u32 %v105_v30, %v104_v37  ;;  %v108_v46 = vrot.slane %v104_v37, 4  ;;  %v138_v47 = vrot.slane %v136_v38, 6  ;;  %v115_v48 = vor.u32 %v113_v33, %v112_v41  ;;  %v123_v50 = vld [vmem:[#allocation2] sm:$0xf] }
  0x1c   :  { %1254 = vmatpush.bf16.msra.mxu3 %v1179_v21  ;;  %375 = vmatpush.bf16.msra.mxu1 %v1179_v21  ;;  %v117_v49 = vrot.slane %v112_v41, 4  ;;  %v141_v51 = vrot.slane %v139_v43, 7  ;;  %v127_v55 = vld [vmem:[#allocation2 + $0x8] sm:$0x1]  ;;  %v1176_v1 = vld [vmem:[#allocation7 + $0x8] sm:$0xff]  ;;  %v1183_v6 = vld [vmem:[#allocation7 + $0x40] sm:$0xff] }
  0x1d   :  { %v124_v54 = vsel %vm1468_vm15, %v107_v45, %v123_v50  ;;  %v1177_v56 = vld [vmem:[#allocation7 + $0x10] sm:$0xff]  ;;  %v116_v57 = vsel %vm1474_vm0, %v108_v46, %v115_v48  ;;  %v1198_v10 = vld [vmem:[#allocation7 + $0xb8] sm:$0xff]  ;;  %v1175_v11 = vld [vmem:[#allocation7] sm:$0xff] }
  0x1e   :  { %125 = vst [vmem:[#allocation2] sm:$0xf] %v124_v54  ;;  %v128_v58 = vsel %vm1439_vm8, %v117_v49, %v127_v55  ;;  %v142_v59 = vor.u32 %v141_v51, %v138_v47  ;;  %v159_v60 = vld [vmem:[#allocation2 + $0x8] sm:$0xe]  ;;  %v1196_v28 = vld [vmem:[#allocation7 + $0xa8] sm:$0xff]  ;;  %v1195_v31 = vld [vmem:[#allocation7 + $0xa0] sm:$0xff] }
  0x1f   :  { %1247 = vmatpush.bf16.msra.mxu2 %v1186_v35  ;;  %299 = vmatpush.bf16.msra.mxu0 %v1186_v35  ;;  %126 = vst [vmem:[#allocation2 + $0x4] sm:$0xf] %v116_v57  ;;  %v1197_v22 = vld [vmem:[#allocation7 + $0xb0] sm:$0xff]  ;;  %v1194_v32 = vld [vmem:[#allocation7 + $0x98] sm:$0xff]  ;;  %v1192_v38 = vld [vmem:[#allocation7 + $0x88] sm:$0xff] }
  0x20   :  { %1255 = vmatpush.bf16.msra.mxu3 %v1178_v39  ;;  %376 = vmatpush.bf16.msra.mxu1 %v1178_v39  ;;  %129 = vst [vmem:[#allocation2 + $0x8] sm:$0x1] %v128_v58  ;;  %v143_v61 = vrot.slane %v142_v59, 4  ;;  %v160_v62 = vsel %vm1480_vm6, %v142_v59, %v159_v60  ;;  %v1193_v34 = vld [vmem:[#allocation7 + $0x90] sm:$0xff]  ;;  %v1191_v41 = vld [vmem:[#allocation7 + $0x80] sm:$0xff]  ;;  %v1207_v51 = vld [vmem:[#allocation9 + $0x38] sm:$0xff] }
  0x21   :  { %161 = vst [vmem:[#allocation2 + $0x8] sm:$0xe] %v160_v62  ;;  %v91_v49 = vld [vmem:[#allocation3] sm:$0x1]  ;;  %v1205_v55 = vld [vmem:[#allocation9 + $0x28] sm:$0xff]  ;;  %v1202_v60 = vld [vmem:[#allocation9 + $0x10] sm:$0xff] }
  0x22   :  { %v189_v0 = vld [vmem:[#allocation2 + $0x10] sm:$0x3]  ;;  %v152_v3 = vsel %vm134_vm1, %v143_v61, %v1453_v24  ;;  %v92_v50 = vsel %vm1439_vm8, 0, %v91_v49  ;;  %v1217_v4 = vld [vmem:[#allocation9 + $0x88] sm:$0xff]  ;;  %v1216_v49 = vld [vmem:[#allocation9 + $0x80] sm:$0xff] }
  0x23   :  { %1248 = vmatpush.bf16.msra.mxu2 %v1185_v52  ;;  %300 = vmatpush.bf16.msra.mxu0 %v1185_v52  ;;  %v172_v2 = vld [vmem:[#allocation2 + $0x10] sm:$0x1]  ;;  %v216_v5 = vunpack.c.l.b16 %v189_v0  ;;  %162 = vst [vmem:[#allocation2 + $0xc] sm:$0xf] %v152_v3  ;;  %v1206_v52 = vld [vmem:[#allocation9 + $0x30] sm:$0xff]  ;;  %v1201_v0 = vld [vmem:[#allocation9 + $0x8] sm:$0xff] }
  0x24   :  { %1256 = vmatpush.bf16.msra.mxu3 %v1177_v56  ;;  %377 = vmatpush.bf16.msra.mxu1 %v1177_v56  ;;  %v319_v9 = vunpack.c.l.b16 %v172_v2  ;;  %93 = vst [vmem:[#allocation3] sm:$0x1] %v92_v50  ;;  %v1204_v56 = vld [vmem:[#allocation9 + $0x20] sm:$0xff]  ;;  %v1203_v59 = vld [vmem:[#allocation9 + $0x18] sm:$0xff]  ;;  %v1214_v2 = vld [vmem:[#allocation9 + $0x70] sm:$0xff] }
  0x25   :  { %v219_v8 = vpack.c.b16 %v216_v5, %v216_v5  ;;  %v1238_v37 = vld [vmem:[#allocation2] sm:$0xe]  ;;  %v1223_v61 = vld [vmem:[#allocation9 + $0xb8] sm:$0xff]  ;;  %v1200_v3 = vld [vmem:[#allocation9] sm:$0xff] }
  0x26   :  { %v1225_v12 = vld [vmem:[#allocation2] sm:$0xff]   ;;  %v320_v20 = vpack.c.b16 %v319_v9, %v319_v9 }
  0x27   :  { %1249 = vmatpush.bf16.msra.mxu2 %v1184_v63  ;;  %301 = vmatpush.bf16.msra.mxu0 %v1184_v63  ;;  %v237_v14 = vshll.u32 %v219_v8, 16  ;;  %v241_v16 = vshrl.u32 %v219_v8, 16  ;;  %v224_v17 = vshll.u32 %v1225_v12, 16  ;;  %v222_v18 = vshrl.u32 %v1225_v12, 16  ;;  %v1237_v36 = vld [vmem:[#allocation2] sm:$0xf0] }
  0x28   :  { %1257 = vmatpush.bf16.msra.mxu3 %v1176_v1  ;;  %378 = vmatpush.bf16.msra.mxu1 %v1176_v1  ;;  %v1239_v39 = vor.u32 %v1238_v37, %v1237_v36  ;;  %v420_v47 = vrot.slane %v219_v8, 1  ;;  %v1215_v63 = vld [vmem:[#allocation9 + $0x78] sm:$0xff]  ;;  %v1222_v1 = vld [vmem:[#allocation9 + $0xb0] sm:$0xff]  ;;  %v1508_v9 = vld [vmem:[%s1558_s2] ss:$0 sm:$0xff] }
  0x29   :  { %v239_v19 = vrot.slane %v237_v14, 1  ;;  %v226_v21 = vrot.slane %v224_v17, 1  ;;  %v1210_v36 = vld [vmem:[#allocation9 + $0x50] sm:$0xff] }
  0x2a   :  { %v1174_v23 = vld [vmem:[#allocation2 + $0x8] sm:$0xff]  ;;  %v417_v43 = vrot.slane %v1239_v39, 1 }
  0x2b   :  { %1250 = vmatpush.bf16.msra.mxu2 %v1183_v6  ;;  %302 = vmatpush.bf16.msra.mxu0 %v1183_v6  ;;  %v243_v24 = vor.u32 %v241_v16, %v239_v19  ;;  %v227_v25 = vor.u32 %v226_v21, %v222_v18  ;;  %v229_v26 = vshll.u32 %v1174_v23, 16  ;;  %v233_v33 = vshrl.u32 %v1174_v23, 16  ;;  %v1221_v6 = vld [vmem:[#allocation9 + $0xa8] sm:$0xff]  ;;  %v1220_v16 = vld [vmem:[#allocation9 + $0xa0] sm:$0xff]  ;;  %v568_v37 = vld [vmem:[#allocation3] sm:$0xf] }
  0x2c   :  { %1258 = vmatpush.bf16.msra.mxu3 %v1175_v11  ;;  %379 = vmatpush.bf16.msra.mxu1 %v1175_v11  ;;  %v418_v45 = vrot.slane %v1174_v23, 1  ;;  %v1212_v18 = vld [vmem:[#allocation9 + $0x60] sm:$0xff] }
  0x2d   :  { %v231_v29 = vrot.slane %v229_v26, 1 }
  0x2e   :  { %313 = vmatmul.bf16.vlgmr.msra.gmra.mxu2 %v243_v24  ;;  %v419_v46 = vsel %vm416_vm5, %v417_v43, %v418_v45  ;;  %v421_v48 = vsel %vm416_vm5, %v418_v45, %v420_v47  ;;  %v1211_v24 = vld [vmem:[#allocation9 + $0x58] sm:$0xff]  ;;  %v1209_v45 = vld [vmem:[#allocation9 + $0x48] sm:$0xff] }
  0x2f   :  { %473 = vmatpush.bf16.msrb.mxu2 %v1198_v10  ;;  %390 = vmatmul.bf16.vlgmr.msra.gmra.mxu3 %v320_v20  ;;  %v232_v30 = vsel %vm220_vm4, %v227_v25, %v231_v29  ;;  %v235_v35 = vor.u32 %v233_v33, %v231_v29  ;;  %v1213_v10 = vld [vmem:[#allocation9 + $0x68] sm:$0xff]  ;;  %v1219_v20 = vld [vmem:[#allocation9 + $0x98] sm:$0xff] }
  0x30   :  { %380 = vmatmul.bf16.vlgmr.msra.gmra.mxu1 %v1225_v12  ;;  %303 = vmatmul.bf16.vlgmr.msra.gmra.mxu0 %v232_v30  ;;  %v1218_v30 = vld [vmem:[#allocation9 + $0x90] sm:$0xff] }
  0x31   :  { %v240_v40 = vsel %vm220_vm4, %v235_v35, %v239_v19  ;;  %786 = vmatpush.bf16.msrb.mxu0 %v1207_v51  ;;  %886 = vmatpush.bf16.msrb.mxu1 %v1223_v61 }
  0x32   :  { %709 = vmatpush.bf16.msrb.mxu3 %v1215_v63 }
  0x33   :  { %474 = vmatpush.bf16.msrb.mxu2 %v1197_v22 }
  0x35   :  { %787 = vmatpush.bf16.msrb.mxu0 %v1206_v52  ;;  %887 = vmatpush.bf16.msrb.mxu1 %v1222_v1 }
  0x36   :  { %710 = vmatpush.bf16.msrb.mxu3 %v1214_v2 }
  0x37   :  { %475 = vmatpush.bf16.msrb.mxu2 %v1196_v28 }
  0x39   :  { %788 = vmatpush.bf16.msrb.mxu0 %v1205_v55  ;;  %888 = vmatpush.bf16.msrb.mxu1 %v1221_v6  ;;  %v1208_v55 = vld [vmem:[#allocation9 + $0x40] sm:$0xff] }
  0x3a   :  { %711 = vmatpush.bf16.msrb.mxu3 %v1213_v10 }
  0x3b   :  { %476 = vmatpush.bf16.msrb.mxu2 %v1195_v31 }
  0x3d   :  { %789 = vmatpush.bf16.msrb.mxu0 %v1204_v56  ;;  %889 = vmatpush.bf16.msrb.mxu1 %v1220_v16 }
  0x3e   :  { %712 = vmatpush.bf16.msrb.mxu3 %v1212_v18 }
  0x3f   :  { %477 = vmatpush.bf16.msrb.mxu2 %v1194_v32 }
  0x40   :  { %385 = vmatmul.bf16.gmra.mxu1 %v1174_v23  ;;  %308 = vmatmul.bf16.gmra.mxu0 %v240_v40  ;;  %v94_v23 = vld [vmem:[#allocation3 + $0x10] sm:$0x2] }
  0x41   :  { %790 = vmatpush.bf16.msrb.mxu0 %v1203_v59  ;;  %890 = vmatpush.bf16.msrb.mxu1 %v1219_v20  ;;  %v95_v26 = vsel %vm1425_vm2, 0, %v94_v23  ;;  %vm938_vm2 = vcmask 1042432  }
  0x42   :  { %96 = vst [vmem:[#allocation3 + $0x10] sm:$0x2] %v95_v26  ;;  %713 = vmatpush.bf16.msrb.mxu3 %v1211_v24 }
  0x43   :  { %478 = vmatpush.bf16.msrb.mxu2 %v1193_v34 }
  0x45   :  { %791 = vmatpush.bf16.msrb.mxu0 %v1202_v60  ;;  %891 = vmatpush.bf16.msrb.mxu1 %v1218_v30 }
  0x46   :  { %714 = vmatpush.bf16.msrb.mxu3 %v1210_v36 }
  0x47   :  { %479 = vmatpush.bf16.msrb.mxu2 %v1192_v38 }
  0x49   :  { %792 = vmatpush.bf16.msrb.mxu0 %v1201_v0  ;;  %892 = vmatpush.bf16.msrb.mxu1 %v1217_v4  ;;  %v574_v36 = vld [vmem:[#allocation3 + $0x10] sm:$0x3] }
  0x4a   :  { %715 = vmatpush.bf16.msrb.mxu3 %v1209_v45 }
  0x4b   :  { %480 = vmatpush.bf16.msrb.mxu2 %v1191_v41 }
  0x4d   :  { %793 = vmatpush.bf16.msrb.mxu0 %v1200_v3  ;;  %893 = vmatpush.bf16.msrb.mxu1 %v1216_v49 }
  0x4e   :  { %481 = vmatmul.bf16.vlgmr.msrb.gmra.mxu2 %v419_v46  ;;  %716 = vmatpush.bf16.msrb.mxu3 %v1208_v55 }
  0x5e   :  { %486 = vmatmul.bf16.gmra.mxu2 %v421_v48 }
  0x6e   :  { %491 = vmatmul.bf16.gmra.mxu2 %v420_v47 }
  0xad   :  { %v381_v13 = vpop.f32.mrf.mxu1  ;;  %v304_v62 = vpop.f32.mrf.mxu0 }
  0xae   :  { %v382_v5 = vadd.f32 %v381_v13, %v304_v62 }
  0xb1   :  { %v1501_v53 = vpop.f32.mrf.mxu2 }
  0xb2   :  { %v1503_v54 = vpop.f32.mrf.mxu3 }
  0xb3   :  { %v392_v10 = vadd.f32 %v1503_v54, %v1501_v53 }
  0xb5   :  { %v383_v8 = vpop.f32.mrf.mxu1  ;;  %v306_v11 = vpop.f32.mrf.mxu0 }
  0xb6   :  { %v384_v21 = vadd.f32 %v383_v8, %v306_v11 }
  0xb9   :  { %v316_v57 = vpop.f32.mrf.mxu2 }
  0xba   :  { %v393_v58 = vpop.f32.mrf.mxu3 }
  0xbd   :  { %v309_v31 = vpop.f32.mrf.mxu0  ;;  %v386_v32 = vpop.f32.mrf.mxu1 }
  0xbe   :  { %v387_v39 = vadd.f32 %v386_v32, %v309_v31 }
  0xc5   :  { %v311_v56 = vpop.f32.mrf.mxu0  ;;  %v388_v57 = vpop.f32.mrf.mxu1 }
  0xc6   :  { %v389_v13 = vadd.f32 %v388_v57, %v311_v56 }
  0xd1   :  { %v482_v12 = vpop.f32.mrf.mxu2 }
  0xd2   :  { %v496_v14 = vadd.f32 %v482_v12, %v382_v5 }
  0xd4   :  { %v505_v17 = vadd.f32 %v1508_v9, %v496_v14 }
  0xd6   :  { %v510_v19 = vmax.f32 %v505_v17, 0.0 }
  0xd8   :  { %v515_v22 = vpack.c.bf16 %v510_v19, %v510_v19 }
  0xd9   :  { %v484_v25 = vpop.f32.mrf.mxu2 }
  0xda   :  { %v521_v28 = vshrl.u32 %v515_v22, 16  ;;  %v497_v29 = vadd.f32 %v484_v25, %v384_v21  ;;  %v524_v34 = vshll.u32 %v515_v22, 16 }
  0xdc   :  { %v523_v33 = vrot.slane %v521_v28, 7  ;;  %v506_v35 = vadd.f32 %v1508_v9, %v497_v29 }
  0xde   :  { %v526_v38 = vor.u32 %v524_v34, %v523_v33  ;;  %v511_v40 = vmax.f32 %v506_v35, 0.0  ;;  %v527_v58 = vrot.slane %v523_v33, 4 }
  0xe0   :  { %v569_v41 = vsel %vm1468_vm15, %v526_v38, %v568_v37  ;;  %v516_v43 = vpack.c.bf16 %v511_v40, %v511_v40 }
  0xe1   :  { %570 = vst [vmem:[#allocation3] sm:$0xf] %v569_v41  ;;  %v487_v46 = vpop.f32.mrf.mxu2 }
  0xe2   :  { %v529_v47 = vshrl.u32 %v516_v43, 16  ;;  %v498_v48 = vadd.f32 %v487_v46, %v387_v39  ;;  %v532_v51 = vshll.u32 %v516_v43, 16 }
  0xe4   :  { %v531_v50 = vrot.slane %v529_v47, 7  ;;  %v507_v52 = vadd.f32 %v1508_v9, %v498_v48 }
  0xe6   :  { %v534_v42 = vor.u32 %v532_v51, %v531_v50  ;;  %v512_v59 = vmax.f32 %v507_v52, 0.0  ;;  %v536_v5 = vrot.slane %v531_v50, 4 }
  0xe8   :  { %v535_v60 = vsel %vm1474_vm0, %v527_v58, %v534_v42  ;;  %v517_v61 = vpack.c.bf16 %v512_v59, %v512_v59  ;;  %v1241_v38 = vld [vmem:[#allocation3] sm:$0xe] }
  0xe9   :  { %571 = vst [vmem:[#allocation3 + $0x4] sm:$0xf] %v535_v60  ;;  %v489_v62 = vpop.f32.mrf.mxu2 }
  0xea   :  { %v538_v63 = vshrl.u32 %v517_v61, 16  ;;  %v499_v0 = vadd.f32 %v489_v62, %v389_v13  ;;  %v541_v2 = vshll.u32 %v517_v61, 16 }
  0xec   :  { %v540_v1 = vrot.slane %v538_v63, 7  ;;  %v508_v3 = vadd.f32 %v1508_v9, %v499_v0 }
  0xee   :  { %v543_v6 = vor.u32 %v541_v2, %v540_v1  ;;  %v513_v8 = vmax.f32 %v508_v3, 0.0  ;;  %v545_v22 = vrot.slane %v540_v1, 4 }
  0xf0   :  { %v544_v11 = vsel %vm1474_vm0, %v536_v5, %v543_v6  ;;  %v518_v12 = vpack.c.bf16 %v513_v8, %v513_v8  ;;  %v1229_v14 = vld [vmem:[#allocation3] sm:$0xff]  }
  0xf1   :  { %572 = vst [vmem:[#allocation3 + $0x8] sm:$0xf] %v544_v11  ;;  %v492_v16 = vpop.f32.mrf.mxu2  ;;  %794 = vmatmul.bf16.vlgmr.msrb.gmra.mxu0 %v1229_v14  ;;  %v1240_v33 = vld [vmem:[#allocation3] sm:$0xf0]  ;;  %v638_v37 = vshll.u32 %v1229_v14, 16  ;;  %v636_v41 = vshrl.u32 %v1229_v14, 16 }
  0xf2   :  { %v547_v17 = vshrl.u32 %v518_v12, 16  ;;  %v500_v18 = vadd.f32 %v492_v16, %v392_v10  ;;  %v550_v20 = vshll.u32 %v518_v12, 16  ;;  %v1242_v39 = vor.u32 %v1241_v38, %v1240_v33  ;;  %v1266_v14 = vld [vmem:[%s1560_s4] ss:$0 sm:$0xff]  ;;  %s1374_s4 = smov [#allocation10]  }
  0xf3   :  { %v640_v40 = vrot.slane %v638_v37, 1  ;;  %s957_s10 = sshll.u32 %s1374_s4, 4  ;;  %s958_s10 = int_to_ptr.vmem [resolvable:$true] %s957_s10 }
  0xf4   :  { %v549_v19 = vrot.slane %v547_v17, 7  ;;  %v509_v21 = vadd.f32 %v1508_v9, %v500_v18  ;;  %v830_v43 = vrot.slane %v1242_v39, 1 }
  0xf5   :  { %v641_v47 = vor.u32 %v640_v40, %v636_v41 }
  0xf6   :  { %v552_v23 = vor.u32 %v550_v20, %v549_v19  ;;  %v514_v24 = vmax.f32 %v509_v21, 0.0  ;;  %v554_v34 = vrot.slane %v549_v19, 4 }
  0xf8   :  { %v577_v25 = vld [vmem:[#allocation3 + $0x8] sm:$0x1]  ;;  %v580_v26 = vld [vmem:[#allocation3 + $0x8] sm:$0x2]  ;;  %v553_v53 = vsel %vm1474_vm0, %v545_v22, %v552_v23  ;;  %v519_v54 = vpack.c.bf16 %v514_v24, %v514_v24 }
  0xf9   :  { %v578_v28 = vsel %vm1445_vm10, 0, %v577_v25  ;;  %v581_v29 = vsel %vm1431_vm7, 0, %v580_v26  ;;  %573 = vst [vmem:[#allocation3 + $0xc] sm:$0xf] %v553_v53  ;;  %v494_v30 = vpop.f32.mrf.mxu2  ;;  %vm939_vm7 = vcmask 1046532  }
  0xfa   :  { %579 = vst [vmem:[#allocation3 + $0x8] sm:$0x1] %v578_v28  ;;  %v556_v31 = vshrl.u32 %v519_v54, 16  ;;  %v559_v32 = vshll.u32 %v519_v54, 16  ;;  %vm1542_vm8 = vmor %vm938_vm2, %vm939_vm7 }
  0xfb   :  { %582 = vst [vmem:[#allocation3 + $0x8] sm:$0x2] %v581_v29 }
  0xfc   :  { %v558_v9 = vrot.slane %v556_v31, 7 }
  0xfe   :  { %v561_v35 = vor.u32 %v559_v32, %v558_v9 }
 0x100   :  { %v562_v15 = vsel %vm1474_vm0, %v554_v34, %v561_v35 }
 0x101   :  { %v575_v7 = vsel %vm1459_vm13, %v562_v15, %v574_v36 }
 0x102   :  { %576 = vst [vmem:[#allocation3 + $0x10] sm:$0x3] %v575_v7  ;;  %v1199_v4 = vld [vmem:[#allocation3 + $0x8] sm:$0xff] }
 0x103   :  { %799 = vmatmul.bf16.gmra.mxu0 %v1199_v4  ;;  %v831_v45 = vrot.slane %v1199_v4, 1  ;;  %v643_v46 = vshll.u32 %v1199_v4, 16  ;;  %v647_v42 = vshrl.u32 %v1199_v4, 16 }
 0x105   :  { %v832_v48 = vsel %vm416_vm5, %v830_v43, %v831_v45  ;;  %v645_v49 = vrot.slane %v643_v46, 1 }
 0x106   :  { %894 = vmatmul.bf16.vlgmr.msrb.gmra.mxu1 %v832_v48 }
 0x107   :  { %v646_v44 = vsel %vm220_vm4, %v641_v47, %v645_v49  ;;  %v649_v13 = vor.u32 %v647_v42, %v645_v49 }
 0x108   :  { %717 = vmatmul.bf16.vlgmr.msrb.gmra.mxu3 %v646_v44 }
 0x109   :  { %v604_v50 = vld [vmem:[#allocation3 + $0x10] sm:$0x3] }
 0x10a   :  { %v631_v51 = vunpack.c.l.b16 %v604_v50  ;;  %v587_v27 = vld [vmem:[#allocation3 + $0x10] sm:$0x1] }
 0x10b   :  { %v733_v55 = vunpack.c.l.b16 %v587_v27 }
 0x10c   :  { %v634_v52 = vpack.c.b16 %v631_v51, %v631_v51 }
 0x10d   :  { %v734_v57 = vpack.c.b16 %v733_v55, %v733_v55 }
 0x10e   :  { %v651_v56 = vshll.u32 %v634_v52, 16  ;;  %v833_v58 = vrot.slane %v634_v52, 1  ;;  %v655_v62 = vshrl.u32 %v634_v52, 16 }
 0x110   :  { %v653_v59 = vrot.slane %v651_v56, 1  ;;  %v834_v60 = vsel %vm416_vm5, %v831_v45, %v833_v58 }
 0x112   :  { %v654_v61 = vsel %vm220_vm4, %v649_v13, %v653_v59  ;;  %v657_v63 = vor.u32 %v655_v62, %v653_v59 }
 0x113   :  { %804 = vmatmul.bf16.gmra.mxu0 %v734_v57 }
 0x116   :  { %899 = vmatmul.bf16.gmra.mxu1 %v834_v60 }
 0x118   :  { %722 = vmatmul.bf16.gmra.mxu3 %v654_v61 }
 0x126   :  { %904 = vmatmul.bf16.gmra.mxu1 %v833_v58 }
 0x128   :  { %727 = vmatmul.bf16.gmra.mxu3 %v657_v63 }
 0x16e   :  { %v795_v0 = vpop.f32.mrf.mxu0 }
 0x176   :  { %v797_v1 = vpop.f32.mrf.mxu0 }
 0x180   :  { %v800_v2 = vpop.f32.mrf.mxu0 }
 0x183   :  { %v895_v3 = vpop.f32.mrf.mxu1 }
 0x188   :  { %v802_v5 = vpop.f32.mrf.mxu0 }
 0x18b   :  { %v718_v6 = vpop.f32.mrf.mxu3  ;;  %v897_v8 = vpop.f32.mrf.mxu1 }
 0x18c   :  { %v796_v10 = vadd.f32 %v795_v0, %v718_v6 }
 0x18e   :  { %v909_v12 = vadd.f32 %v895_v3, %v796_v10 }
 0x190   :  { %v805_v11 = vpop.f32.mrf.mxu0  ;;  %v918_v19 = vadd.f32 %v1266_v14, %v909_v12 }
 0x192   :  { %v923_v23 = vmax.f32 %v918_v19, 0.0 }
 0x193   :  { %v720_v16 = vpop.f32.mrf.mxu3  ;;  %v900_v17 = vpop.f32.mrf.mxu1 }
 0x194   :  { %v798_v18 = vadd.f32 %v797_v1, %v720_v16 }
 0x196   :  { %v910_v20 = vadd.f32 %v897_v8, %v798_v18 }
 0x198   :  { %v919_v21 = vadd.f32 %v1266_v14, %v910_v20  ;;  %v807_v22 = vpop.f32.mrf.mxu0 }
 0x19a   :  { %v924_v24 = vmax.f32 %v919_v21, 0.0 }
 0x19b   :  { %v723_v25 = vpop.f32.mrf.mxu3  ;;  %v902_v26 = vpop.f32.mrf.mxu1 }
 0x19c   :  { %v1235_v53 = vpack.c.bf16 %v924_v24, %v923_v23  ;;  %v801_v54 = vadd.f32 %v800_v2, %v723_v25 }
 0x19e   :  { %1236 = vst [vmem:[#allocation10] sm:$0xff] %v1235_v53   ;;  %v911_v28 = vadd.f32 %v900_v17, %v801_v54 }
 0x1a0   :  { %v920_v29 = vadd.f32 %v1266_v14, %v911_v28 }
 0x1a2   :  { %v925_v32 = vmax.f32 %v920_v29, 0.0 }
 0x1a3   :  { %v725_v30 = vpop.f32.mrf.mxu3  ;;  %v905_v31 = vpop.f32.mrf.mxu1 }
 0x1a4   :  { %v803_v9 = vadd.f32 %v802_v5, %v725_v30  ;;  %v930_v35 = vpack.c.bf16 %v925_v32, %v925_v32 }
 0x1a6   :  { %v912_v33 = vadd.f32 %v902_v26, %v803_v9  ;;  %v1173_v40 = vrot.slane %v930_v35, 9 }
 0x1a8   :  { %v921_v34 = vadd.f32 %v1266_v14, %v912_v33 }
 0x1aa   :  { %v926_v36 = vmax.f32 %v921_v34, 0.0 }
 0x1ab   :  { %v728_v37 = vpop.f32.mrf.mxu3  ;;  %v907_v38 = vpop.f32.mrf.mxu1 }
 0x1ac   :  { %v931_v15 = vpack.c.bf16 %v926_v36, %v926_v36  ;;  %v806_v39 = vadd.f32 %v805_v11, %v728_v37 }
 0x1ae   :  { %v943_v4 = vrot.slane %v931_v15, 5  ;;  %v913_v41 = vadd.f32 %v905_v31, %v806_v39 }
 0x1b0   :  { %v922_v43 = vadd.f32 %v1266_v14, %v913_v41  ;;  %v944_v45 = vsel %vm1542_vm8, %v1173_v40, %v943_v4  ;;  %v945_v49 = vrot.slane %v943_v4, 4 }
 0x1b1   :  { %951 = vst [vmem:[#allocation10 + $0x8] sm:$0xf] %v944_v45 }
 0x1b2   :  { %v927_v46 = vmax.f32 %v922_v43, 0.0 }
 0x1b3   :  { %v730_v47 = vpop.f32.mrf.mxu3 }
 0x1b4   :  { %v932_v48 = vpack.c.bf16 %v927_v46, %v927_v46 }
 0x1b6   :  { %v946_v44 = vrot.slane %v932_v48, 5 }
 0x1b8   :  { %v947_v50 = vsel %vm1542_vm8, %v945_v49, %v946_v44 }
 0x1b9   :  { %952 = vst [vmem:[#allocation10 + $0xc] sm:$0xf] %v947_v50 }
 0x1ba   :  { %965 = dma.vmem_to_hbm [thread:$0]  %s958_s10, 256, %s960_s13, [#allocation6], %s1370_s26, %s1370_s26, %s1371_s27  }
 0x1bb   :  { %1367 = dma.done.wait [#allocation6], 256  }
 0x1bc   :  { %1368 = vsyncadd [#allocation6], 4294967040 }
 0x1bd   :  { %970 = vsyncpa [#allocation5], 1 }
 0x1be   :  { %971 = vsyncpa [#allocation8], 1 }
 0x1bf   :  { %972 = vsyncpa [#allocation6], 1 }

// kernel: tpu_custom_call.1
= control target key start
LH: loop header
LB: loop body
LE: loop exit
PB: predicated region body
PF: predicated region fallthrough
CT: control target
= control target key end

     0   :  { %10 = vsyncpa [#allocation5], 0  ;;  %s1556_s0 = inlined_call_operand.hbm [shape: bf16[2,16,128], index: 0, kind: input, shape index: {}]   ;;  %s1557_s1 = inlined_call_operand.hbm [shape: bf16[3,128,128], index: 1, kind: input, shape index: {}]   ;;  %s1558_s2 = inlined_call_operand.vmem [shape: f32[1,128], index: 2, kind: input, shape index: {}]   ;;  %s1559_s3 = inlined_call_operand.hbm [shape: bf16[3,128,128], index: 3, kind: input, shape index: {}]   ;;  %s1560_s4 = inlined_call_operand.vmem [shape: f32[1,128], index: 4, kind: input, shape index: {}]   ;;  %s1561_s5 = inlined_call_operand.hbm [shape: bf16[2,16,128], index: 5, kind: output, shape index: {}]  }
   0x1   :  { %11 = vsyncpa [#allocation8], 0 }
   0x2   :  { %12 = vsyncpa [#allocation6], 0  ;;  %s30_s20 = sshll.u32 %s1557_s1, 4  ;;  %s1369_s21 = smov [#allocation7]   ;;  %s31_s20 = int_to_ptr.hbm [resolvable:$true] %s30_s20 }
   0x3   :  { %s32_s22 = sshll.u32 %s1369_s21, 4  ;;  %s17_s25 = sshll.u32 %s1556_s0, 4  ;;  %s33_s22 = int_to_ptr.vmem [resolvable:$true] %s32_s22  ;;  %s18_s25 = int_to_ptr.hbm [resolvable:$true] %s17_s25 }
   0x4   :  { %s1370_s26 = smov 64   ;;  %s1371_s27 = smov 4  }
   0x5   :  { %38 = dma.hbm_to_vmem [thread:$0]  %s31_s20, 3072, %s33_s22, [#allocation8], %s1370_s26, %s1370_s26, %s1371_s27  }
   0x6   :  { %s1372_s28 = smov [#allocation4]   ;;  %s45_s1 = sshll.u32 %s1559_s3, 4  ;;  %s46_s1 = int_to_ptr.hbm [resolvable:$true] %s45_s1 }
   0x7   :  { %s19_s29 = sshll.u32 %s1372_s28, 4  ;;  %s1373_s0 = smov [#allocation9]   ;;  %s20_s29 = int_to_ptr.vmem [resolvable:$true] %s19_s29 }
   0x8   :  { %25 = dma.hbm_to_vmem [thread:$0]  %s18_s25, 256, %s20_s29, [#allocation5], %s1370_s26, %s1370_s26, %s1371_s27  }
   0x9   :  { %s47_s7 = sshll.u32 %s1373_s0, 4  ;;  %s48_s7 = int_to_ptr.vmem [resolvable:$true] %s47_s7 }
   0xa   :  { %53 = dma.hbm_to_vmem [thread:$0]  %s46_s1, 3072, %s48_s7, [#allocation8], %s1370_s26, %s1370_s26, %s1371_s27  }
   0xb   :  { %1363 = dma.done.wait [#allocation5], 256  }
   0xc   :  { %1364 = vsyncadd [#allocation5], 4294967040 }
   0xd   :  { %1365 = dma.done.wait [#allocation8], 6144  }
   0xe   :  { %1366 = vsyncadd [#allocation8], 4294961152  ;;  %v1190_v0 = vld [vmem:[#allocation7 + $0x78] sm:$0xff]  ;;  %vm80_vm0 = vcmask 1041409   ;;  %vm86_vm1 = vsmask.f32 7942 }
   0xf   :  { %v1182_v1 = vld [vmem:[#allocation7 + $0x38] sm:$0xff]  ;;  %1243 = vmatpush.bf16.msra.mxu2 %v1190_v0  ;;  %v1189_v2 = vld [vmem:[#allocation7 + $0x70] sm:$0xff]  ;;  %295 = vmatpush.bf16.msra.mxu0 %v1190_v0  ;;  %vm1425_vm2 = vmand %vm80_vm0, %vm86_vm1  ;;  %vm69_vm3 = vcmask 1040384   ;;  %vm70_vm4 = vsmask.f32 256  ;;  %vm163_vm9 = vcmask 1041408  }
  0x10   :  { %1251 = vmatpush.bf16.msra.mxu3 %v1182_v1  ;;  %v1181_v3 = vld [vmem:[#allocation7 + $0x30] sm:$0xff]  ;;  %372 = vmatpush.bf16.msra.mxu1 %v1182_v1  ;;  %vm81_vm5 = vsmask.f32 1280  ;;  %v88_v5 = vld [vmem:[#allocation2 + $0x10] sm:$0x2]  ;;  %v1188_v6 = vld [vmem:[#allocation7 + $0x68] sm:$0xff] }
  0x11   :  { %vm75_vm6 = vsmask.f32 7938  ;;  %vm1431_vm7 = vmand %vm80_vm0, %vm81_vm5  ;;  %v89_v8 = vsel %vm1425_vm2, 0, %v88_v5  ;;  %v132_v9 = vld [vmem:[#allocation4 + $0xc] sm:$0xf]  ;;  %v1180_v10 = vld [vmem:[#allocation7 + $0x28] sm:$0xff] }
  0x12   :  { %90 = vst [vmem:[#allocation2 + $0x10] sm:$0x2] %v89_v8  ;;  %v145_v11 = vshrl.u32 %v132_v9, 16  ;;  %v148_v12 = vshll.u32 %v132_v9, 16  ;;  %vm1439_vm8 = vmand %vm69_vm3, %vm70_vm4  ;;  %v72_v14 = vld [vmem:[#allocation2] sm:$0x1] }
  0x13   :  { %1244 = vmatpush.bf16.msra.mxu2 %v1189_v2  ;;  %296 = vmatpush.bf16.msra.mxu0 %v1189_v2  ;;  %vm1445_vm10 = vmand %vm69_vm3, %vm75_vm6  ;;  %vm99_vm11 = vsmask.f32 4368  ;;  %v1187_v16 = vld [vmem:[#allocation7 + $0x60] sm:$0xff]  ;;  %v73_v19 = vsel %vm1439_vm8, 0, %v72_v14  ;;  %v77_v20 = vld [vmem:[#allocation2 + $0x8] sm:$0x1] }
  0x14   :  { %1252 = vmatpush.bf16.msra.mxu3 %v1181_v3  ;;  %373 = vmatpush.bf16.msra.mxu1 %v1181_v3  ;;  %v147_v17 = vrot.slane %v145_v11, 6  ;;  %v150_v18 = vrot.slane %v148_v12, 7  ;;  %v1179_v21 = vld [vmem:[#allocation7 + $0x20] sm:$0xff]  ;;  %74 = vst [vmem:[#allocation2] sm:$0x1] %v73_v19  ;;  %v78_v22 = vsel %vm1445_vm10, 0, %v77_v20  ;;  %vm1459_vm13 = vmand %vm163_vm9, %vm81_vm5 }
  0x15   :  { %v83_v23 = vld [vmem:[#allocation2 + $0x8] sm:$0x2]  ;;  %79 = vst [vmem:[#allocation2 + $0x8] sm:$0x1] %v78_v22  ;;  %vm121_vm12 = vcmask 1043456   ;;  %v1186_v35 = vld [vmem:[#allocation7 + $0x58] sm:$0xff]  ;;  %vm1474_vm0 = vmor %vm70_vm4, %vm99_vm11 }
  0x16   :  { %v1453_v24 = vor.u32 %v150_v18, %v147_v17  ;;  %v84_v25 = vsel %vm1431_vm7, 0, %v83_v23  ;;  %v97_v26 = vld [vmem:[#allocation4] sm:$0xf]  ;;  %v98_v28 = vld [vmem:[#allocation4 + $0x4] sm:$0xf]  ;;  %v1178_v39 = vld [vmem:[#allocation7 + $0x18] sm:$0xff] }
  0x17   :  { %1245 = vmatpush.bf16.msra.mxu2 %v1188_v6  ;;  %297 = vmatpush.bf16.msra.mxu0 %v1188_v6  ;;  %85 = vst [vmem:[#allocation2 + $0x8] sm:$0x2] %v84_v25  ;;  %v102_v29 = vshrl.u32 %v97_v26, 16  ;;  %v105_v30 = vshll.u32 %v97_v26, 16  ;;  %v110_v32 = vshrl.u32 %v98_v28, 16  ;;  %v113_v33 = vshll.u32 %v98_v28, 16  ;;  %vm1468_vm15 = vmand %vm121_vm12, %vm75_vm6 }
  0x18   :  { %1253 = vmatpush.bf16.msra.mxu3 %v1180_v10  ;;  %374 = vmatpush.bf16.msra.mxu1 %v1180_v10  ;;  %v153_v31 = vrot.slane %v1453_v24, 4  ;;  %v131_v34 = vld [vmem:[#allocation4 + $0x8] sm:$0xf]  ;;  %vm157_vm14 = vcmask 1043457   ;;  %vm133_vm3 = vsmask.f32 5392 }
  0x19   :  { %v165_v36 = vld [vmem:[#allocation2 + $0x10] sm:$0x3]  ;;  %v104_v37 = vrot.slane %v102_v29, 7  ;;  %v136_v38 = vshrl.u32 %v131_v34, 16  ;;  %v112_v41 = vrot.slane %v110_v32, 7  ;;  %v139_v43 = vshll.u32 %v131_v34, 16  ;;  %vm1480_vm6 = vmand %vm157_vm14, %vm86_vm1 }
  0x1a   :  { %v166_v40 = vsel %vm1459_vm13, %v153_v31, %v165_v36  ;;  %v1185_v52 = vld [vmem:[#allocation7 + $0x50] sm:$0xff]  ;;  %vm134_vm1 = vmor %vm81_vm5, %vm133_vm3  ;;  %v1184_v63 = vld [vmem:[#allocation7 + $0x48] sm:$0xff]  ;;  %vm220_vm4 = vsmask.f32 7424  ;;  %vm416_vm5 = vcmask 1046528   ;;  %s959_s13 = sshll.u32 %s1561_s5, 4  ;;  %s960_s13 = int_to_ptr.hbm [resolvable:$true] %s959_s13 }
  0x1b   :  { %1246 = vmatpush.bf16.msra.mxu2 %v1187_v16  ;;  %298 = vmatpush.bf16.msra.mxu0 %v1187_v16  ;;  %167 = vst [vmem:[#allocation2 + $0x10] sm:$0x3] %v166_v40  ;;  %v107_v45 = vor.u32 %v105_v30, %v104_v37  ;;  %v108_v46 = vrot.slane %v104_v37, 4  ;;  %v138_v47 = vrot.slane %v136_v38, 6  ;;  %v115_v48 = vor.u32 %v113_v33, %v112_v41  ;;  %v123_v50 = vld [vmem:[#allocation2] sm:$0xf] }
  0x1c   :  { %1254 = vmatpush.bf16.msra.mxu3 %v1179_v21  ;;  %375 = vmatpush.bf16.msra.mxu1 %v1179_v21  ;;  %v117_v49 = vrot.slane %v112_v41, 4  ;;  %v141_v51 = vrot.slane %v139_v43, 7  ;;  %v127_v55 = vld [vmem:[#allocation2 + $0x8] sm:$0x1]  ;;  %v1176_v1 = vld [vmem:[#allocation7 + $0x8] sm:$0xff]  ;;  %v1183_v6 = vld [vmem:[#allocation7 + $0x40] sm:$0xff] }
  0x1d   :  { %v124_v54 = vsel %vm1468_vm15, %v107_v45, %v123_v50  ;;  %v1177_v56 = vld [vmem:[#allocation7 + $0x10] sm:$0xff]  ;;  %v116_v57 = vsel %vm1474_vm0, %v108_v46, %v115_v48  ;;  %v1198_v10 = vld [vmem:[#allocation7 + $0xb8] sm:$0xff]  ;;  %v1175_v11 = vld [vmem:[#allocation7] sm:$0xff] }
  0x1e   :  { %125 = vst [vmem:[#allocation2] sm:$0xf] %v124_v54  ;;  %v128_v58 = vsel %vm1439_vm8, %v117_v49, %v127_v55  ;;  %v142_v59 = vor.u32 %v141_v51, %v138_v47  ;;  %v159_v60 = vld [vmem:[#allocation2 + $0x8] sm:$0xe]  ;;  %v1196_v28 = vld [vmem:[#allocation7 + $0xa8] sm:$0xff]  ;;  %v1195_v31 = vld [vmem:[#allocation7 + $0xa0] sm:$0xff] }
  0x1f   :  { %1247 = vmatpush.bf16.msra.mxu2 %v1186_v35  ;;  %299 = vmatpush.bf16.msra.mxu0 %v1186_v35  ;;  %126 = vst [vmem:[#allocation2 + $0x4] sm:$0xf] %v116_v57  ;;  %v1197_v22 = vld [vmem:[#allocation7 + $0xb0] sm:$0xff]  ;;  %v1194_v32 = vld [vmem:[#allocation7 + $0x98] sm:$0xff]  ;;  %v1192_v38 = vld [vmem:[#allocation7 + $0x88] sm:$0xff] }
  0x20   :  { %1255 = vmatpush.bf16.msra.mxu3 %v1178_v39  ;;  %376 = vmatpush.bf16.msra.mxu1 %v1178_v39  ;;  %129 = vst [vmem:[#allocation2 + $0x8] sm:$0x1] %v128_v58  ;;  %v143_v61 = vrot.slane %v142_v59, 4  ;;  %v160_v62 = vsel %vm1480_vm6, %v142_v59, %v159_v60  ;;  %v1193_v34 = vld [vmem:[#allocation7 + $0x90] sm:$0xff]  ;;  %v1191_v41 = vld [vmem:[#allocation7 + $0x80] sm:$0xff]  ;;  %v1207_v51 = vld [vmem:[#allocation9 + $0x38] sm:$0xff] }
  0x21   :  { %161 = vst [vmem:[#allocation2 + $0x8] sm:$0xe] %v160_v62  ;;  %v91_v49 = vld [vmem:[#allocation3] sm:$0x1]  ;;  %v1205_v55 = vld [vmem:[#allocation9 + $0x28] sm:$0xff]  ;;  %v1202_v60 = vld [vmem:[#allocation9 + $0x10] sm:$0xff] }
  0x22   :  { %v189_v0 = vld [vmem:[#allocation2 + $0x10] sm:$0x3]  ;;  %v152_v3 = vsel %vm134_vm1, %v143_v61, %v1453_v24  ;;  %v92_v50 = vsel %vm1439_vm8, 0, %v91_v49  ;;  %v1217_v4 = vld [vmem:[#allocation9 + $0x88] sm:$0xff]  ;;  %v1216_v49 = vld [vmem:[#allocation9 + $0x80] sm:$0xff] }
  0x23   :  { %1248 = vmatpush.bf16.msra.mxu2 %v1185_v52  ;;  %300 = vmatpush.bf16.msra.mxu0 %v1185_v52  ;;  %v172_v2 = vld [vmem:[#allocation2 + $0x10] sm:$0x1]  ;;  %v216_v5 = vunpack.c.l.b16 %v189_v0  ;;  %162 = vst [vmem:[#allocation2 + $0xc] sm:$0xf] %v152_v3  ;;  %v1206_v52 = vld [vmem:[#allocation9 + $0x30] sm:$0xff]  ;;  %v1201_v0 = vld [vmem:[#allocation9 + $0x8] sm:$0xff] }
  0x24   :  { %1256 = vmatpush.bf16.msra.mxu3 %v1177_v56  ;;  %377 = vmatpush.bf16.msra.mxu1 %v1177_v56  ;;  %v319_v9 = vunpack.c.l.b16 %v172_v2  ;;  %93 = vst [vmem:[#allocation3] sm:$0x1] %v92_v50  ;;  %v1204_v56 = vld [vmem:[#allocation9 + $0x20] sm:$0xff]  ;;  %v1203_v59 = vld [vmem:[#allocation9 + $0x18] sm:$0xff]  ;;  %v1214_v2 = vld [vmem:[#allocation9 + $0x70] sm:$0xff] }
  0x25   :  { %v219_v8 = vpack.c.b16 %v216_v5, %v216_v5  ;;  %v1238_v37 = vld [vmem:[#allocation2] sm:$0xe]  ;;  %v1223_v61 = vld [vmem:[#allocation9 + $0xb8] sm:$0xff]  ;;  %v1200_v3 = vld [vmem:[#allocation9] sm:$0xff] }
  0x26   :  { %v1225_v12 = vld [vmem:[#allocation2] sm:$0xff]   ;;  %v320_v20 = vpack.c.b16 %v319_v9, %v319_v9 }
  0x27   :  { %1249 = vmatpush.bf16.msra.mxu2 %v1184_v63  ;;  %301 = vmatpush.bf16.msra.mxu0 %v1184_v63  ;;  %v237_v14 = vshll.u32 %v219_v8, 16  ;;  %v241_v16 = vshrl.u32 %v219_v8, 16  ;;  %v224_v17 = vshll.u32 %v1225_v12, 16  ;;  %v222_v18 = vshrl.u32 %v1225_v12, 16  ;;  %v1237_v36 = vld [vmem:[#allocation2] sm:$0xf0] }
  0x28   :  { %1257 = vmatpush.bf16.msra.mxu3 %v1176_v1  ;;  %378 = vmatpush.bf16.msra.mxu1 %v1176_v1  ;;  %v1239_v39 = vor.u32 %v1238_v37, %v1237_v36  ;;  %v420_v47 = vrot.slane %v219_v8, 1  ;;  %v1215_v63 = vld [vmem:[#allocation9 + $0x78] sm:$0xff]  ;;  %v1222_v1 = vld [vmem:[#allocation9 + $0xb0] sm:$0xff]  ;;  %v1508_v9 = vld [vmem:[%s1558_s2] ss:$0 sm:$0xff] }
  0x29   :  { %v239_v19 = vrot.slane %v237_v14, 1  ;;  %v226_v21 = vrot.slane %v224_v17, 1  ;;  %v1210_v36 = vld [vmem:[#allocation9 + $0x50] sm:$0xff] }
  0x2a   :  { %v1174_v23 = vld [vmem:[#allocation2 + $0x8] sm:$0xff]  ;;  %v417_v43 = vrot.slane %v1239_v39, 1 }
  0x2b   :  { %1250 = vmatpush.bf16.msra.mxu2 %v1183_v6  ;;  %302 = vmatpush.bf16.msra.mxu0 %v1183_v6  ;;  %v243_v24 = vor.u32 %v241_v16, %v239_v19  ;;  %v227_v25 = vor.u32 %v226_v21, %v222_v18  ;;  %v229_v26 = vshll.u32 %v1174_v23, 16  ;;  %v233_v33 = vshrl.u32 %v1174_v23, 16  ;;  %v1221_v6 = vld [vmem:[#allocation9 + $0xa8] sm:$0xff]  ;;  %v1220_v16 = vld [vmem:[#allocation9 + $0xa0] sm:$0xff]  ;;  %v568_v37 = vld [vmem:[#allocation3] sm:$0xf] }
  0x2c   :  { %1258 = vmatpush.bf16.msra.mxu3 %v1175_v11  ;;  %379 = vmatpush.bf16.msra.mxu1 %v1175_v11  ;;  %v418_v45 = vrot.slane %v1174_v23, 1  ;;  %v1212_v18 = vld [vmem:[#allocation9 + $0x60] sm:$0xff] }
  0x2d   :  { %v231_v29 = vrot.slane %v229_v26, 1 }
  0x2e   :  { %313 = vmatmul.bf16.vlgmr.msra.gmra.mxu2 %v243_v24  ;;  %v419_v46 = vsel %vm416_vm5, %v417_v43, %v418_v45  ;;  %v421_v48 = vsel %vm416_vm5, %v418_v45, %v420_v47  ;;  %v1211_v24 = vld [vmem:[#allocation9 + $0x58] sm:$0xff]  ;;  %v1209_v45 = vld [vmem:[#allocation9 + $0x48] sm:$0xff] }
  0x2f   :  { %473 = vmatpush.bf16.msrb.mxu2 %v1198_v10  ;;  %390 = vmatmul.bf16.vlgmr.msra.gmra.mxu3 %v320_v20  ;;  %v232_v30 = vsel %vm220_vm4, %v227_v25, %v231_v29  ;;  %v235_v35 = vor.u32 %v233_v33, %v231_v29  ;;  %v1213_v10 = vld [vmem:[#allocation9 + $0x68] sm:$0xff]  ;;  %v1219_v20 = vld [vmem:[#allocation9 + $0x98] sm:$0xff] }
  0x30   :  { %380 = vmatmul.bf16.vlgmr.msra.gmra.mxu1 %v1225_v12  ;;  %303 = vmatmul.bf16.vlgmr.msra.gmra.mxu0 %v232_v30  ;;  %v1218_v30 = vld [vmem:[#allocation9 + $0x90] sm:$0xff] }
  0x31   :  { %v240_v40 = vsel %vm220_vm4, %v235_v35, %v239_v19  ;;  %786 = vmatpush.bf16.msrb.mxu0 %v1207_v51  ;;  %886 = vmatpush.bf16.msrb.mxu1 %v1223_v61 }
  0x32   :  { %709 = vmatpush.bf16.msrb.mxu3 %v1215_v63 }
  0x33   :  { %474 = vmatpush.bf16.msrb.mxu2 %v1197_v22 }
  0x35   :  { %787 = vmatpush.bf16.msrb.mxu0 %v1206_v52  ;;  %887 = vmatpush.bf16.msrb.mxu1 %v1222_v1 }
  0x36   :  { %710 = vmatpush.bf16.msrb.mxu3 %v1214_v2 }
  0x37   :  { %475 = vmatpush.bf16.msrb.mxu2 %v1196_v28 }
  0x39   :  { %788 = vmatpush.bf16.msrb.mxu0 %v1205_v55  ;;  %888 = vmatpush.bf16.msrb.mxu1 %v1221_v6  ;;  %v1208_v55 = vld [vmem:[#allocation9 + $0x40] sm:$0xff] }
  0x3a   :  { %711 = vmatpush.bf16.msrb.mxu3 %v1213_v10 }
  0x3b   :  { %476 = vmatpush.bf16.msrb.mxu2 %v1195_v31 }
  0x3d   :  { %789 = vmatpush.bf16.msrb.mxu0 %v1204_v56  ;;  %889 = vmatpush.bf16.msrb.mxu1 %v1220_v16 }
  0x3e   :  { %712 = vmatpush.bf16.msrb.mxu3 %v1212_v18 }
  0x3f   :  { %477 = vmatpush.bf16.msrb.mxu2 %v1194_v32 }
  0x40   :  { %385 = vmatmul.bf16.gmra.mxu1 %v1174_v23  ;;  %308 = vmatmul.bf16.gmra.mxu0 %v240_v40  ;;  %v94_v23 = vld [vmem:[#allocation3 + $0x10] sm:$0x2] }
  0x41   :  { %790 = vmatpush.bf16.msrb.mxu0 %v1203_v59  ;;  %890 = vmatpush.bf16.msrb.mxu1 %v1219_v20  ;;  %v95_v26 = vsel %vm1425_vm2, 0, %v94_v23  ;;  %vm938_vm2 = vcmask 1042432  }
  0x42   :  { %96 = vst [vmem:[#allocation3 + $0x10] sm:$0x2] %v95_v26  ;;  %713 = vmatpush.bf16.msrb.mxu3 %v1211_v24 }
  0x43   :  { %478 = vmatpush.bf16.msrb.mxu2 %v1193_v34 }
  0x45   :  { %791 = vmatpush.bf16.msrb.mxu0 %v1202_v60  ;;  %891 = vmatpush.bf16.msrb.mxu1 %v1218_v30 }
  0x46   :  { %714 = vmatpush.bf16.msrb.mxu3 %v1210_v36 }
  0x47   :  { %479 = vmatpush.bf16.msrb.mxu2 %v1192_v38 }
  0x49   :  { %792 = vmatpush.bf16.msrb.mxu0 %v1201_v0  ;;  %892 = vmatpush.bf16.msrb.mxu1 %v1217_v4  ;;  %v574_v36 = vld [vmem:[#allocation3 + $0x10] sm:$0x3] }
  0x4a   :  { %715 = vmatpush.bf16.msrb.mxu3 %v1209_v45 }
  0x4b   :  { %480 = vmatpush.bf16.msrb.mxu2 %v1191_v41 }
  0x4d   :  { %793 = vmatpush.bf16.msrb.mxu0 %v1200_v3  ;;  %893 = vmatpush.bf16.msrb.mxu1 %v1216_v49 }
  0x4e   :  { %481 = vmatmul.bf16.vlgmr.msrb.gmra.mxu2 %v419_v46  ;;  %716 = vmatpush.bf16.msrb.mxu3 %v1208_v55 }
  0x5e   :  { %486 = vmatmul.bf16.gmra.mxu2 %v421_v48 }
  0x6e   :  { %491 = vmatmul.bf16.gmra.mxu2 %v420_v47 }
  0xad   :  { %v381_v13 = vpop.f32.mrf.mxu1  ;;  %v304_v62 = vpop.f32.mrf.mxu0 }
  0xae   :  { %v382_v5 = vadd.f32 %v381_v13, %v304_v62 }
  0xb1   :  { %v1501_v53 = vpop.f32.mrf.mxu2 }
  0xb2   :  { %v1503_v54 = vpop.f32.mrf.mxu3 }
  0xb3   :  { %v392_v10 = vadd.f32 %v1503_v54, %v1501_v53 }
  0xb5   :  { %v383_v8 = vpop.f32.mrf.mxu1  ;;  %v306_v11 = vpop.f32.mrf.mxu0 }
  0xb6   :  { %v384_v21 = vadd.f32 %v383_v8, %v306_v11 }
  0xb9   :  { %v316_v57 = vpop.f32.mrf.mxu2 }
  0xba   :  { %v393_v58 = vpop.f32.mrf.mxu3 }
  0xbd   :  { %v309_v31 = vpop.f32.mrf.mxu0  ;;  %v386_v32 = vpop.f32.mrf.mxu1 }
  0xbe   :  { %v387_v39 = vadd.f32 %v386_v32, %v309_v31 }
  0xc5   :  { %v311_v56 = vpop.f32.mrf.mxu0  ;;  %v388_v57 = vpop.f32.mrf.mxu1 }
  0xc6   :  { %v389_v13 = vadd.f32 %v388_v57, %v311_v56 }
  0xd1   :  { %v482_v12 = vpop.f32.mrf.mxu2 }
  0xd2   :  { %v496_v14 = vadd.f32 %v482_v12, %v382_v5 }
  0xd4   :  { %v505_v17 = vadd.f32 %v1508_v9, %v496_v14 }
  0xd6   :  { %v510_v19 = vmax.f32 %v505_v17, 0.0 }
  0xd8   :  { %v515_v22 = vpack.c.bf16 %v510_v19, %v510_v19 }
  0xd9   :  { %v484_v25 = vpop.f32.mrf.mxu2 }
  0xda   :  { %v521_v28 = vshrl.u32 %v515_v22, 16  ;;  %v497_v29 = vadd.f32 %v484_v25, %v384_v21  ;;  %v524_v34 = vshll.u32 %v515_v22, 16 }
  0xdc   :  { %v523_v33 = vrot.slane %v521_v28, 7  ;;  %v506_v35 = vadd.f32 %v1508_v9, %v497_v29 }
  0xde   :  { %v526_v38 = vor.u32 %v524_v34, %v523_v33  ;;  %v511_v40 = vmax.f32 %v506_v35, 0.0  ;;  %v527_v58 = vrot.slane %v523_v33, 4 }
  0xe0   :  { %v569_v41 = vsel %vm1468_vm15, %v526_v38, %v568_v37  ;;  %v516_v43 = vpack.c.bf16 %v511_v40, %v511_v40 }
  0xe1   :  { %570 = vst [vmem:[#allocation3] sm:$0xf] %v569_v41  ;;  %v487_v46 = vpop.f32.mrf.mxu2 }
  0xe2   :  { %v529_v47 = vshrl.u32 %v516_v43, 16  ;;  %v498_v48 = vadd.f32 %v487_v46, %v387_v39  ;;  %v532_v51 = vshll.u32 %v516_v43, 16 }
  0xe4   :  { %v531_v50 = vrot.slane %v529_v47, 7  ;;  %v507_v52 = vadd.f32 %v1508_v9, %v498_v48 }
  0xe6   :  { %v534_v42 = vor.u32 %v532_v51, %v531_v50  ;;  %v512_v59 = vmax.f32 %v507_v52, 0.0  ;;  %v536_v5 = vrot.slane %v531_v50, 4 }
  0xe8   :  { %v535_v60 = vsel %vm1474_vm0, %v527_v58, %v534_v42  ;;  %v517_v61 = vpack.c.bf16 %v512_v59, %v512_v59  ;;  %v1241_v38 = vld [vmem:[#allocation3] sm:$0xe] }
  0xe9   :  { %571 = vst [vmem:[#allocation3 + $0x4] sm:$0xf] %v535_v60  ;;  %v489_v62 = vpop.f32.mrf.mxu2 }
  0xea   :  { %v538_v63 = vshrl.u32 %v517_v61, 16  ;;  %v499_v0 = vadd.f32 %v489_v62, %v389_v13  ;;  %v541_v2 = vshll.u32 %v517_v61, 16 }
  0xec   :  { %v540_v1 = vrot.slane %v538_v63, 7  ;;  %v508_v3 = vadd.f32 %v1508_v9, %v499_v0 }
  0xee   :  { %v543_v6 = vor.u32 %v541_v2, %v540_v1  ;;  %v513_v8 = vmax.f32 %v508_v3, 0.0  ;;  %v545_v22 = vrot.slane %v540_v1, 4 }
  0xf0   :  { %v544_v11 = vsel %vm1474_vm0, %v536_v5, %v543_v6  ;;  %v518_v12 = vpack.c.bf16 %v513_v8, %v513_v8  ;;  %v1229_v14 = vld [vmem:[#allocation3] sm:$0xff]  }
  0xf1   :  { %572 = vst [vmem:[#allocation3 + $0x8] sm:$0xf] %v544_v11  ;;  %v492_v16 = vpop.f32.mrf.mxu2  ;;  %794 = vmatmul.bf16.vlgmr.msrb.gmra.mxu0 %v1229_v14  ;;  %v1240_v33 = vld [vmem:[#allocation3] sm:$0xf0]  ;;  %v638_v37 = vshll.u32 %v1229_v14, 16  ;;  %v636_v41 = vshrl.u32 %v1229_v14, 16 }
  0xf2   :  { %v547_v17 = vshrl.u32 %v518_v12, 16  ;;  %v500_v18 = vadd.f32 %v492_v16, %v392_v10  ;;  %v550_v20 = vshll.u32 %v518_v12, 16  ;;  %v1242_v39 = vor.u32 %v1241_v38, %v1240_v33  ;;  %v1266_v14 = vld [vmem:[%s1560_s4] ss:$0 sm:$0xff]  ;;  %s1374_s4 = smov [#allocation10]  }
  0xf3   :  { %v640_v40 = vrot.slane %v638_v37, 1  ;;  %s957_s10 = sshll.u32 %s1374_s4, 4  ;;  %s958_s10 = int_to_ptr.vmem [resolvable:$true] %s957_s10 }
  0xf4   :  { %v549_v19 = vrot.slane %v547_v17, 7  ;;  %v509_v21 = vadd.f32 %v1508_v9, %v500_v18  ;;  %v830_v43 = vrot.slane %v1242_v39, 1 }
  0xf5   :  { %v641_v47 = vor.u32 %v640_v40, %v636_v41 }
  0xf6   :  { %v552_v23 = vor.u32 %v550_v20, %v549_v19  ;;  %v514_v24 = vmax.f32 %v509_v21, 0.0  ;;  %v554_v34 = vrot.slane %v549_v19, 4 }
  0xf8   :  { %v577_v25 = vld [vmem:[#allocation3 + $0x8] sm:$0x1]  ;;  %v580_v26 = vld [vmem:[#allocation3 + $0x8] sm:$0x2]  ;;  %v553_v53 = vsel %vm1474_vm0, %v545_v22, %v552_v23  ;;  %v519_v54 = vpack.c.bf16 %v514_v24, %v514_v24 }
  0xf9   :  { %v578_v28 = vsel %vm1445_vm10, 0, %v577_v25  ;;  %v581_v29 = vsel %vm1431_vm7, 0, %v580_v26  ;;  %573 = vst [vmem:[#allocation3 + $0xc] sm:$0xf] %v553_v53  ;;  %v494_v30 = vpop.f32.mrf.mxu2  ;;  %vm939_vm7 = vcmask 1046532  }
  0xfa   :  { %579 = vst [vmem:[#allocation3 + $0x8] sm:$0x1] %v578_v28  ;;  %v556_v31 = vshrl.u32 %v519_v54, 16  ;;  %v559_v32 = vshll.u32 %v519_v54, 16  ;;  %vm1542_vm8 = vmor %vm938_vm2, %vm939_vm7 }
  0xfb   :  { %582 = vst [vmem:[#allocation3 + $0x8] sm:$0x2] %v581_v29 }
  0xfc   :  { %v558_v9 = vrot.slane %v556_v31, 7 }
  0xfe   :  { %v561_v35 = vor.u32 %v559_v32, %v558_v9 }
 0x100   :  { %v562_v15 = vsel %vm1474_vm0, %v554_v34, %v561_v35 }
 0x101   :  { %v575_v7 = vsel %vm1459_vm13, %v562_v15, %v574_v36 }
 0x102   :  { %576 = vst [vmem:[#allocation3 + $0x10] sm:$0x3] %v575_v7  ;;  %v1199_v4 = vld [vmem:[#allocation3 + $0x8] sm:$0xff] }
 0x103   :  { %799 = vmatmul.bf16.gmra.mxu0 %v1199_v4  ;;  %v831_v45 = vrot.slane %v1199_v4, 1  ;;  %v643_v46 = vshll.u32 %v1199_v4, 16  ;;  %v647_v42 = vshrl.u32 %v1199_v4, 16 }
 0x105   :  { %v832_v48 = vsel %vm416_vm5, %v830_v43, %v831_v45  ;;  %v645_v49 = vrot.slane %v643_v46, 1 }
 0x106   :  { %894 = vmatmul.bf16.vlgmr.msrb.gmra.mxu1 %v832_v48 }
 0x107   :  { %v646_v44 = vsel %vm220_vm4, %v641_v47, %v645_v49  ;;  %v649_v13 = vor.u32 %v647_v42, %v645_v49 }
 0x108   :  { %717 = vmatmul.bf16.vlgmr.msrb.gmra.mxu3 %v646_v44 }
 0x109   :  { %v604_v50 = vld [vmem:[#allocation3 + $0x10] sm:$0x3] }
 0x10a   :  { %v631_v51 = vunpack.c.l.b16 %v604_v50  ;;  %v587_v27 = vld [vmem:[#allocation3 + $0x10] sm:$0x1] }
 0x10b   :  { %v733_v55 = vunpack.c.l.b16 %v587_v27 }
 0x10c   :  { %v634_v52 = vpack.c.b16 %v631_v51, %v631_v51 }
 0x10d   :  { %v734_v57 = vpack.c.b16 %v733_v55, %v733_v55 }
 0x10e   :  { %v651_v56 = vshll.u32 %v634_v52, 16  ;;  %v833_v58 = vrot.slane %v634_v52, 1  ;;  %v655_v62 = vshrl.u32 %v634_v52, 16 }
 0x110   :  { %v653_v59 = vrot.slane %v651_v56, 1  ;;  %v834_v60 = vsel %vm416_vm5, %v831_v45, %v833_v58 }
 0x112   :  { %v654_v61 = vsel %vm220_vm4, %v649_v13, %v653_v59  ;;  %v657_v63 = vor.u32 %v655_v62, %v653_v59 }
 0x113   :  { %804 = vmatmul.bf16.gmra.mxu0 %v734_v57 }
 0x116   :  { %899 = vmatmul.bf16.gmra.mxu1 %v834_v60 }
 0x118   :  { %722 = vmatmul.bf16.gmra.mxu3 %v654_v61 }
 0x126   :  { %904 = vmatmul.bf16.gmra.mxu1 %v833_v58 }
 0x128   :  { %727 = vmatmul.bf16.gmra.mxu3 %v657_v63 }
 0x16e   :  { %v795_v0 = vpop.f32.mrf.mxu0 }
 0x176   :  { %v797_v1 = vpop.f32.mrf.mxu0 }
 0x180   :  { %v800_v2 = vpop.f32.mrf.mxu0 }
 0x183   :  { %v895_v3 = vpop.f32.mrf.mxu1 }
 0x188   :  { %v802_v5 = vpop.f32.mrf.mxu0 }
 0x18b   :  { %v718_v6 = vpop.f32.mrf.mxu3  ;;  %v897_v8 = vpop.f32.mrf.mxu1 }
 0x18c   :  { %v796_v10 = vadd.f32 %v795_v0, %v718_v6 }
 0x18e   :  { %v909_v12 = vadd.f32 %v895_v3, %v796_v10 }
 0x190   :  { %v805_v11 = vpop.f32.mrf.mxu0  ;;  %v918_v19 = vadd.f32 %v1266_v14, %v909_v12 }
 0x192   :  { %v923_v23 = vmax.f32 %v918_v19, 0.0 }
 0x193   :  { %v720_v16 = vpop.f32.mrf.mxu3  ;;  %v900_v17 = vpop.f32.mrf.mxu1 }
 0x194   :  { %v798_v18 = vadd.f32 %v797_v1, %v720_v16 }
 0x196   :  { %v910_v20 = vadd.f32 %v897_v8, %v798_v18 }
 0x198   :  { %v919_v21 = vadd.f32 %v1266_v14, %v910_v20  ;;  %v807_v22 = vpop.f32.mrf.mxu0 }
 0x19a   :  { %v924_v24 = vmax.f32 %v919_v21, 0.0 }
 0x19b   :  { %v723_v25 = vpop.f32.mrf.mxu3  ;;  %v902_v26 = vpop.f32.mrf.mxu1 }
 0x19c   :  { %v1235_v53 = vpack.c.bf16 %v924_v24, %v923_v23  ;;  %v801_v54 = vadd.f32 %v800_v2, %v723_v25 }
 0x19e   :  { %1236 = vst [vmem:[#allocation10] sm:$0xff] %v1235_v53   ;;  %v911_v28 = vadd.f32 %v900_v17, %v801_v54 }
 0x1a0   :  { %v920_v29 = vadd.f32 %v1266_v14, %v911_v28 }
 0x1a2   :  { %v925_v32 = vmax.f32 %v920_v29, 0.0 }
 0x1a3   :  { %v725_v30 = vpop.f32.mrf.mxu3  ;;  %v905_v31 = vpop.f32.mrf.mxu1 }
 0x1a4   :  { %v803_v9 = vadd.f32 %v802_v5, %v725_v30  ;;  %v930_v35 = vpack.c.bf16 %v925_v32, %v925_v32 }
 0x1a6   :  { %v912_v33 = vadd.f32 %v902_v26, %v803_v9  ;;  %v1173_v40 = vrot.slane %v930_v35, 9 }
 0x1a8   :  { %v921_v34 = vadd.f32 %v1266_v14, %v912_v33 }
 0x1aa   :  { %v926_v36 = vmax.f32 %v921_v34, 0.0 }
 0x1ab   :  { %v728_v37 = vpop.f32.mrf.mxu3  ;;  %v907_v38 = vpop.f32.mrf.mxu1 }
 0x1ac   :  { %v931_v15 = vpack.c.bf16 %v926_v36, %v926_v36  ;;  %v806_v39 = vadd.f32 %v805_v11, %v728_v37 }
 0x1ae   :  { %v943_v4 = vrot.slane %v931_v15, 5  ;;  %v913_v41 = vadd.f32 %v905_v31, %v806_v39 }
 0x1b0   :  { %v922_v43 = vadd.f32 %v1266_v14, %v913_v41  ;;  %v944_v45 = vsel %vm1542_vm8, %v1173_v40, %v943_v4  ;;  %v945_v49 = vrot.slane %v943_v4, 4 }
 0x1b1   :  { %951 = vst [vmem:[#allocation10 + $0x8] sm:$0xf] %v944_v45 }
 0x1b2   :  { %v927_v46 = vmax.f32 %v922_v43, 0.0 }
 0x1b3   :  { %v730_v47 = vpop.f32.mrf.mxu3 }
 0x1b4   :  { %v932_v48 = vpack.c.bf16 %v927_v46, %v927_v46 }
 0x1b6   :  { %v946_v44 = vrot.slane %v932_v48, 5 }
 0x1b8   :  { %v947_v50 = vsel %vm1542_vm8, %v945_v49, %v946_v44 }
 0x1b9   :  { %952 = vst [vmem:[#allocation10 + $0xc] sm:$0xf] %v947_v50 }
 0x1ba   :  { %965 = dma.vmem_to_hbm [thread:$0]  %s958_s10, 256, %s960_s13, [#allocation6], %s1370_s26, %s1370_s26, %s1371_s27  }
 0x1bb   :  { %1367 = dma.done.wait [#allocation6], 256  }
 0x1bc   :  { %1368 = vsyncadd [#allocation6], 4294967040 }
 0x1bd   :  { %970 = vsyncpa [#allocation5], 1 }
 0x1be   :  { %971 = vsyncpa [#allocation8], 1 }
 0x1bf   :  { %972 = vsyncpa [#allocation6], 1 }

</bundles_post_ra>
